<compile_context>
chip_gen: v7x
topology: tpu7x:2x2x1
jax: 0.10.0
libtpu: 0.0.40
codegen_flags: <defaults>
</compile_context>

<pallas_src>
import functools

import jax
import jax.numpy as jnp
from jax.experimental import pallas as pl
from jax.experimental.pallas import tpu as pltpu


def _permute_gates_ifgo_to_ifog(w):
    """Reorder the last-dim gate blocks from PyTorch (i,f,g,o) to (i,f,o,g)."""
    H = w.shape[-1] // 4
    return jnp.concatenate(
        [w[..., :2 * H], w[..., 3 * H:], w[..., 2 * H:3 * H]], axis=-1)


def _lstm_recurrent_kernel(gx0_ref, whh0_ref, wih1_ref, whh1_ref, b1_ref,
                           h2_out_ref,
                           h1_s, c1_s, h2_s, c2_s,
                           *, hidden, t_chunk):
    """One grid step = one (t_chunk, bb, .) time chunk of the serial recurrence.

    gx0_ref : (Tc, bb, 4H) bf16   precomputed x @ W_ih0 + (b_ih0 + b_hh0), gates (i,f,o,g)
    whh0_ref: (H, 4H)      bf16   layer-0 recurrent weight
    wih1_ref: (H, 4H)      bf16   layer-1 input weight
    whh1_ref: (H, 4H)      bf16   layer-1 recurrent weight
    b1_ref  : (1, 4H)      f32    layer-1 bias (b_ih1 + b_hh1)
    h2_out  : (Tc, bb, H)  f32    layer-1 hidden states (FC head applied outside)
    """
    H = hidden
    t_blk = pl.program_id(1)

    # Fresh h/c at the start of every batch block's time loop.  Correct only because the
    # time axis is the innermost grid axis (iterated fully per batch block).
    @pl.when(t_blk == 0)
    def _():
        h1_s[...] = jnp.zeros_like(h1_s)
        c1_s[...] = jnp.zeros_like(c1_s)
        h2_s[...] = jnp.zeros_like(h2_s)
        c2_s[...] = jnp.zeros_like(c2_s)

    bb = h1_s.shape[0]
    whh0 = whh0_ref[...]
    wih1 = wih1_ref[...]
    whh1 = whh1_ref[...]
    # Hoisted bias broadcast: JAX does not CSE broadcast_in_dim, so doing this inside the
    # (unrolled) loop would emit tc redundant broadcasts per grid step.
    b1b = jnp.broadcast_to(b1_ref[...], (bb, 4 * H))

    def gate_combine(gates, c):
        # Gate columns pre-permuted to (i, f, o, g): sigmoid on [:3H], tanh on [3H:].
        sig = jax.nn.sigmoid(gates[:, :3 * H])
        g = jnp.tanh(gates[:, 3 * H:])
        i = sig[:, 0 * H:1 * H]
        f = sig[:, 1 * H:2 * H]
        o = sig[:, 2 * H:3 * H]
        c_new = f * c + i * g
        h_new = o * jnp.tanh(c_new)
        return h_new, c_new

    def step(t, carry):
        h1, c1, h2, c2 = carry
        # layer 0: input projection precomputed; only h @ W_hh stays on the serial path.
        gates0 = gx0_ref[t].astype(jnp.float32) + jnp.dot(
            h1.astype(jnp.bfloat16), whh0, preferred_element_type=jnp.float32)
        h1, c1 = gate_combine(gates0, c1)
        # layer 1: two bf16 dots, no per-step lane concat on the critical path.
        gates1 = (jnp.dot(h1.astype(jnp.bfloat16), wih1,
                          preferred_element_type=jnp.float32)
                  + jnp.dot(h2.astype(jnp.bfloat16), whh1,
                            preferred_element_type=jnp.float32)
                  + b1b)
        h2, c2 = gate_combine(gates1, c2)
        # TODO(synk): for H < 128 (toy config) this is a sub-lane-width masked store; at
        # production H >= 128 it is lane-dense.  If tiny H matters, emit a (tc, bb*H)
        # slab and reshape outside instead.
        h2_out_ref[t] = h2.astype(h2_out_ref.dtype)
        return (h1, c1, h2, c2)

    carry = (h1_s[...], c1_s[...], h2_s[...], c2_s[...])
    # Partial unroll: keeps LLO scheduling visibility without spilling the 64-vreg file.
    h1, c1, h2, c2 = jax.lax.fori_loop(0, t_chunk, step, carry,
                                       unroll=min(8, t_chunk))
    h1_s[...] = h1
    c1_s[...] = c1
    h2_s[...] = h2
    c2_s[...] = c2


def lstm2_fc_pallas(x, params, *, time_chunk=None, batch_block=None,
                    single_buffer_weights=False):
    """x: (B, T, D) float32 -> (B, T, H) float32.

    single_buffer_weights: set True on v7x / at production H to stop double-buffering the
    constant-index weight blocks (pl.Buffered(1)); off by default since the toy weights
    are tiny and double-buffering them costs nothing.
    """
    B, T, D = x.shape
    H = params["whh0"].shape[0]

    # ---- one-time gate-column permutation (i,f,g,o) -> (i,f,o,g) ----
    wih0 = _permute_gates_ifgo_to_ifog(params["wih0"])
    whh0 = _permute_gates_ifgo_to_ifog(params["whh0"])
    b0 = _permute_gates_ifgo_to_ifog(params["b0"])
    wih1 = _permute_gates_ifgo_to_ifog(params["wih1"])
    whh1 = _permute_gates_ifgo_to_ifog(params["whh1"])
    b1 = _permute_gates_ifgo_to_ifog(params["b1"])

    # ---- hoisted layer-0 input projection: one large lane-dense matmul, streamed bf16 ----
    x_tm = jnp.transpose(x, (1, 0, 2))                                        # (T, B, D)
    gx0 = (jnp.einsum("tbd,dg->tbg", x_tm, wih0) + b0).astype(jnp.bfloat16)   # (T, B, 4H)

    # bf16 MXU operands for the recurrent dots; gate math / h,c carries stay f32.
    whh0 = whh0.astype(jnp.bfloat16)
    wih1 = wih1.astype(jnp.bfloat16)
    whh1 = whh1.astype(jnp.bfloat16)
    b1 = b1.astype(jnp.float32)

    # ---- batch block ----
    # TODO(synk): on v7x set batch_block = B // 2 (multiple of 8, ideally >= 128) so the
    # "parallel" batch axis shards across both TensorCores; on all gens, pack independent
    # sequences into the batch dim so the MXU M dimension is filled (bb >= 128/256).
    if batch_block is None:
        batch_block = B
    bb = batch_block
    assert B % bb == 0, "batch_block must divide B"

    # ---- time chunk from a VMEM budget; the time tail is zero-padded ----
    if time_chunk is None:
        row_bytes = bb * 4 * H * 2 + bb * H * 4            # bf16 gx0 row + f32 out row
        tc_cap = max(1, (8 * 1024 * 1024) // (2 * row_bytes))   # ~8 MiB streamed budget
        time_chunk = max(1, min(32, T, tc_cap))
    tc = time_chunk
    t_pad = pl.cdiv(T, tc) * tc
    if t_pad != T:
        # Padding at the end of time is safe: the recurrence runs forward, padded steps
        # only affect padded outputs, which are sliced off below.
        gx0 = jnp.pad(gx0, ((0, t_pad - T), (0, 0), (0, 0)))

    def const_spec(shape):
        # Constant-index weight blocks never change across the grid; on v7x / production H
        # single-buffer them to halve their VMEM footprint.
        if single_buffer_weights:
            return pl.BlockSpec(shape, lambda b, t: (0, 0),
                                pipeline_mode=pl.Buffered(1))
        return pl.BlockSpec(shape, lambda b, t: (0, 0))

    kernel = functools.partial(_lstm_recurrent_kernel, hidden=H, t_chunk=tc)

    grid_spec = pltpu.PrefetchScalarGridSpec(
        num_scalar_prefetch=0,
        grid=(B // bb, t_pad // tc),
        in_specs=[
            pl.BlockSpec((tc, bb, 4 * H), lambda b, t: (t, b, 0)),  # gx0 time chunk
            const_spec((H, 4 * H)),                                 # W_hh layer 0
            const_spec((H, 4 * H)),                                 # W_ih layer 1
            const_spec((H, 4 * H)),                                 # W_hh layer 1
            const_spec((1, 4 * H)),                                 # bias layer 1
        ],
        out_specs=pl.BlockSpec((tc, bb, H), lambda b, t: (t, b, 0)),
        scratch_shapes=[pltpu.VMEM((bb, H), jnp.float32)] * 4,      # h1, c1, h2, c2
    )

    # Explicit VMEM budget: double-buffered streamed blocks + (possibly double-buffered)
    # weights + scratch, with 2x headroom; never below the 32 MiB scoped default.
    est = (2 * (tc * bb * 4 * H * 2 + tc * bb * H * 4)
           + 2 * (3 * H * 4 * H * 2 + 4 * H * 4)
           + 4 * bb * H * 4)
    vmem_limit = int(min(128 * 2**20, max(32 * 2**20, 2 * est + (4 << 20))))

    h2_tm = pl.pallas_call(
        kernel,
        out_shape=jax.ShapeDtypeStruct((t_pad, B, H), jnp.float32),
        grid_spec=grid_spec,
        compiler_params=pltpu.CompilerParams(
            # Batch blocks are independent (megacore-shardable); the time axis carries the
            # recurrence and must stay "arbitrary" AND innermost (scratch-carry invariant).
            dimension_semantics=("parallel", "arbitrary"),
            vmem_limit_bytes=vmem_limit),
    )(gx0, whh0, wih1, whh1, b1)

    h2_tm = h2_tm[:T]
    # ---- hoisted FC head: one batched lane-dense matmul over all T*B rows ----
    y_tm = jnp.einsum("tbh,hk->tbk", h2_tm, params["wfc"]) + params["bfc"]
    return jnp.transpose(y_tm, (1, 0, 2))                                     # (B, T, H)


def lstm2_fc_ref(x, params):
    """Pure-JAX f32 reference matching torch.nn.LSTM(num_layers=2, batch_first=True) + Linear."""
    B, T, D = x.shape
    H = params["whh0"].shape[0]

    def cell(x_in, h, c, wih, whh, b):
        gates = x_in @ wih + h @ whh + b
        i = jax.nn.sigmoid(gates[:, 0 * H:1 * H])
        f = jax.nn.sigmoid(gates[:, 1 * H:2 * H])
        g = jnp.tanh(gates[:, 2 * H:3 * H])
        o = jax.nn.sigmoid(gates[:, 3 * H:4 * H])
        c_new = f * c + i * g
        return o * jnp.tanh(c_new), c_new

    def step(carry, x_t):
        h1, c1, h2, c2 = carry
        h1, c1 = cell(x_t, h1, c1, params["wih0"], params["whh0"], params["b0"])
        h2, c2 = cell(h1, h2, c2, params["wih1"], params["whh1"], params["b1"])
        return (h1, c1, h2, c2), h2

    z = jnp.zeros((B, H), jnp.float32)
    _, hs = jax.lax.scan(step, (z, z, z, z), jnp.transpose(x, (1, 0, 2)))
    hs = jnp.transpose(hs, (1, 0, 2))  # (B, T, H)
    return hs @ params["wfc"] + params["bfc"]


def init_params(key, input_dim, hidden):
    """Deterministic init mirroring PyTorch shapes; weights stored pre-transposed (in, 4H),
    gate order kept in the canonical PyTorch (i,f,g,o) — the kernel wrapper permutes."""
    k = 1.0 / jnp.sqrt(hidden)
    keys = jax.random.split(key, 11)

    def u(kk, shape):
        return jax.random.uniform(kk, shape, jnp.float32, -k, k)

    # PyTorch: weight_ih_l0 (4H, D), weight_hh_l0 (4H, H), biases (4H,) x2; same for l1.
    wih0 = u(keys[0], (4 * hidden, input_dim)).T                            # (D, 4H)
    whh0 = u(keys[1], (4 * hidden, hidden)).T                               # (H, 4H)
    b0 = (u(keys[2], (4 * hidden,)) + u(keys[3], (4 * hidden,)))[None, :]   # b_ih + b_hh
    wih1 = u(keys[4], (4 * hidden, hidden)).T
    whh1 = u(keys[5], (4 * hidden, hidden)).T
    b1 = (u(keys[6], (4 * hidden,)) + u(keys[7], (4 * hidden,)))[None, :]
    wfc = u(keys[8], (hidden, hidden)).T                                    # (H, H)
    bfc = u(keys[9], (hidden,))[None, :]
    return dict(wih0=wih0, whh0=whh0, b0=b0,
                wih1=wih1, whh1=whh1, b1=b1,
                wfc=wfc, bfc=bfc)


if __name__ == "__main__":
    B, T, D, H = 2, 8, 16, 32  # batch, seq, input_dim, hidden_dim

    root = jax.random.PRNGKey(0)
    kx, kp = jax.random.split(root)
    x = jax.random.normal(kx, (B, T, D), jnp.float32)
    params = init_params(kp, D, H)

    out = jax.block_until_ready(lstm2_fc_pallas(x, params))
    ref = jax.block_until_ready(lstm2_fc_ref(x, params))

    assert out.shape == (B, T, H)
    # bf16 MXU operands in the recurrence -> relaxed tolerance vs. the f32 reference.
    assert jnp.allclose(out, ref, atol=5e-2, rtol=5e-2), "mismatch vs reference"
    print("KERNEL_OK")
</pallas_src>

<mosaic_0001>
module attributes {stable_mosaic.version = 11 : i64} {
  func.func @_lstm_recurrent_kernel(%arg0: i32, %arg1: i32, %arg2: memref<8x2x128xbf16, #tpu.memory_space<vmem>>, %arg3: memref<32x128xbf16, #tpu.memory_space<vmem>>, %arg4: memref<32x128xbf16, #tpu.memory_space<vmem>>, %arg5: memref<32x128xbf16, #tpu.memory_space<vmem>>, %arg6: memref<1x128xf32, #tpu.memory_space<vmem>>, %arg7: memref<8x2x32xf32, #tpu.memory_space<vmem>>, %arg8: memref<2x32xf32, #tpu.memory_space<vmem>>, %arg9: memref<2x32xf32, #tpu.memory_space<vmem>>, %arg10: memref<2x32xf32, #tpu.memory_space<vmem>>, %arg11: memref<2x32xf32, #tpu.memory_space<vmem>>) attributes {dimension_semantics = [#tpu.dimension_semantics<parallel>, #tpu.dimension_semantics<arbitrary>], iteration_bounds = array<i64: 1, 1>, scalar_prefetch = 0 : i64, scratch_operands = 4 : i64, tpu.core_type = #tpu.core_type<tc>, window_params = [{transform_indices = @transform_0, window_bounds = array<i64: 8, 2, 128>}, {pipeline_mode = #tpu.pipeline_mode<synchronous>, transform_indices = @transform_1, window_bounds = array<i64: 32, 128>}, {pipeline_mode = #tpu.pipeline_mode<synchronous>, transform_indices = @transform_2, window_bounds = array<i64: 32, 128>}, {pipeline_mode = #tpu.pipeline_mode<synchronous>, transform_indices = @transform_3, window_bounds = array<i64: 32, 128>}, {pipeline_mode = #tpu.pipeline_mode<synchronous>, transform_indices = @transform_4, window_bounds = array<i64: 1, 128>}, {transform_indices = @transform_5, window_bounds = array<i64: 8, 2, 32>}]} {
    %c0_i32 = arith.constant 0 : i32
    %0 = arith.cmpi eq, %arg1, %c0_i32 : i32
    %1 = arith.extui %0 : i1 to i32
    %c0_i32_0 = arith.constant 0 : i32
    %2 = arith.cmpi ne, %1, %c0_i32_0 : i32
    scf.if %2 {
      %cst_96 = arith.constant 0.000000e+00 : f32
      %409 = vector.broadcast %cst_96 : f32 to vector<2x32xf32>
      %c0_97 = arith.constant 0 : index
      %c0_98 = arith.constant 0 : index
      %410 = vector.load %arg8[%c0_97, %c0_98] : memref<2x32xf32, #tpu.memory_space<vmem>>, vector<2x32xf32>
      tpu.vector_store %arg8[%c0_97, %c0_98], %409 {strides = array<i32>} : memref<2x32xf32, #tpu.memory_space<vmem>>, vector<2x32xf32>,
      %cst_99 = arith.constant 0.000000e+00 : f32
      %411 = vector.broadcast %cst_99 : f32 to vector<2x32xf32>
      %c0_100 = arith.constant 0 : index
      %c0_101 = arith.constant 0 : index
      %412 = vector.load %arg9[%c0_100, %c0_101] : memref<2x32xf32, #tpu.memory_space<vmem>>, vector<2x32xf32>
      tpu.vector_store %arg9[%c0_100, %c0_101], %411 {strides = array<i32>} : memref<2x32xf32, #tpu.memory_space<vmem>>, vector<2x32xf32>,
      %cst_102 = arith.constant 0.000000e+00 : f32
      %413 = vector.broadcast %cst_102 : f32 to vector<2x32xf32>
      %c0_103 = arith.constant 0 : index
      %c0_104 = arith.constant 0 : index
      %414 = vector.load %arg10[%c0_103, %c0_104] : memref<2x32xf32, #tpu.memory_space<vmem>>, vector<2x32xf32>
      tpu.vector_store %arg10[%c0_103, %c0_104], %413 {strides = array<i32>} : memref<2x32xf32, #tpu.memory_space<vmem>>, vector<2x32xf32>,
      %cst_105 = arith.constant 0.000000e+00 : f32
      %415 = vector.broadcast %cst_105 : f32 to vector<2x32xf32>
      %c0_106 = arith.constant 0 : index
      %c0_107 = arith.constant 0 : index
      %416 = vector.load %arg11[%c0_106, %c0_107] : memref<2x32xf32, #tpu.memory_space<vmem>>, vector<2x32xf32>
      tpu.vector_store %arg11[%c0_106, %c0_107], %415 {strides = array<i32>} : memref<2x32xf32, #tpu.memory_space<vmem>>, vector<2x32xf32>,
    } else {
    }
    %c0 = arith.constant 0 : index
    %c0_1 = arith.constant 0 : index
    %3 = vector.load %arg3[%c0, %c0_1] : memref<32x128xbf16, #tpu.memory_space<vmem>>, vector<32x128xbf16>
    %c0_2 = arith.constant 0 : index
    %c0_3 = arith.constant 0 : index
    %4 = vector.load %arg4[%c0_2, %c0_3] : memref<32x128xbf16, #tpu.memory_space<vmem>>, vector<32x128xbf16>
    %c0_4 = arith.constant 0 : index
    %c0_5 = arith.constant 0 : index
    %5 = vector.load %arg5[%c0_4, %c0_5] : memref<32x128xbf16, #tpu.memory_space<vmem>>, vector<32x128xbf16>
    %c0_6 = arith.constant 0 : index
    %c0_7 = arith.constant 0 : index
    %6 = vector.load %arg6[%c0_6, %c0_7] : memref<1x128xf32, #tpu.memory_space<vmem>>, vector<1x128xf32>
    %7 = vector.shape_cast %6 : vector<1x128xf32> to vector<1x128xf32>
    %8 = vector.broadcast %7 : vector<1x128xf32> to vector<2x128xf32>
    %c0_8 = arith.constant 0 : index
    %c0_9 = arith.constant 0 : index
    %9 = vector.load %arg8[%c0_8, %c0_9] : memref<2x32xf32, #tpu.memory_space<vmem>>, vector<2x32xf32>
    %c0_10 = arith.constant 0 : index
    %c0_11 = arith.constant 0 : index
    %10 = vector.load %arg9[%c0_10, %c0_11] : memref<2x32xf32, #tpu.memory_space<vmem>>, vector<2x32xf32>
    %c0_12 = arith.constant 0 : index
    %c0_13 = arith.constant 0 : index
    %11 = vector.load %arg10[%c0_12, %c0_13] : memref<2x32xf32, #tpu.memory_space<vmem>>, vector<2x32xf32>
    %c0_14 = arith.constant 0 : index
    %c0_15 = arith.constant 0 : index
    %12 = vector.load %arg11[%c0_14, %c0_15] : memref<2x32xf32, #tpu.memory_space<vmem>>, vector<2x32xf32>
    %c0_i32_16 = arith.constant 0 : i32
    %13 = arith.index_cast %c0_i32_16 : i32 to index
    %c0_17 = arith.constant 0 : index
    %c0_18 = arith.constant 0 : index
    %14 = vector.load %arg2[%13, %c0_17, %c0_18] : memref<8x2x128xbf16, #tpu.memory_space<vmem>>, vector<1x2x128xbf16>
    %15 = vector.shape_cast %14 : vector<1x2x128xbf16> to vector<2x128xbf16>
    %16 = arith.extf %15 : vector<2x128xbf16> to vector<2x128xf32>
    %17 = arith.truncf %9 : vector<2x32xf32> to vector<2x32xbf16>
    %cst = arith.constant dense<0.000000e+00> : vector<2x128xf32>
    %18 = tpu.matmul %17, %3, %cst {dimension_numbers = #tpu.dot_dimension_numbers<[1], [0], [0], [1], [0, 0, 1, 1], [], []>} : vector<2x32xbf16>, vector<32x128xbf16>, vector<2x128xf32> -> vector<2x128xf32>
    %19 = arith.addf %16, %18 : vector<2x128xf32>
    %20 = vector.extract_strided_slice %19 {offsets = [0, 0], sizes = [2, 96], strides = [1, 1]} : vector<2x128xf32> to vector<2x96xf32>
    %21 = arith.negf %20 : vector<2x96xf32>
    %22 = math.exp %21 : vector<2x96xf32>
    %cst_19 = arith.constant 1.000000e+00 : f32
    %23 = vector.broadcast %cst_19 : f32 to vector<2x96xf32>
    %24 = arith.addf %23, %22 : vector<2x96xf32>
    %25 = arith.divf %23, %24 : vector<2x96xf32>
    %26 = vector.extract_strided_slice %19 {offsets = [0, 96], sizes = [2, 32], strides = [1, 1]} : vector<2x128xf32> to vector<2x32xf32>
    %27 = math.tanh %26 : vector<2x32xf32>
    %28 = vector.extract_strided_slice %25 {offsets = [0, 0], sizes = [2, 32], strides = [1, 1]} : vector<2x96xf32> to vector<2x32xf32>
    %29 = vector.extract_strided_slice %25 {offsets = [0, 32], sizes = [2, 32], strides = [1, 1]} : vector<2x96xf32> to vector<2x32xf32>
    %30 = vector.extract_strided_slice %25 {offsets = [0, 64], sizes = [2, 32], strides = [1, 1]} : vector<2x96xf32> to vector<2x32xf32>
    %31 = arith.mulf %29, %10 : vector<2x32xf32>
    %32 = arith.mulf %28, %27 : vector<2x32xf32>
    %33 = arith.addf %31, %32 : vector<2x32xf32>
    %34 = math.tanh %33 : vector<2x32xf32>
    %35 = arith.mulf %30, %34 : vector<2x32xf32>
    %36 = arith.truncf %35 : vector<2x32xf32> to vector<2x32xbf16>
    %cst_20 = arith.constant dense<0.000000e+00> : vector<2x128xf32>
    %37 = tpu.matmul %36, %4, %cst_20 {dimension_numbers = #tpu.dot_dimension_numbers<[1], [0], [0], [1], [0, 0, 1, 1], [], []>} : vector<2x32xbf16>, vector<32x128xbf16>, vector<2x128xf32> -> vector<2x128xf32>
    %38 = arith.truncf %11 : vector<2x32xf32> to vector<2x32xbf16>
    %cst_21 = arith.constant dense<0.000000e+00> : vector<2x128xf32>
    %39 = tpu.matmul %38, %5, %cst_21 {dimension_numbers = #tpu.dot_dimension_numbers<[1], [0], [0], [1], [0, 0, 1, 1], [], []>} : vector<2x32xbf16>, vector<32x128xbf16>, vector<2x128xf32> -> vector<2x128xf32>
    %40 = arith.addf %37, %39 : vector<2x128xf32>
    %41 = arith.addf %40, %8 : vector<2x128xf32>
    %42 = vector.extract_strided_slice %41 {offsets = [0, 0], sizes = [2, 96], strides = [1, 1]} : vector<2x128xf32> to vector<2x96xf32>
    %43 = arith.negf %42 : vector<2x96xf32>
    %44 = math.exp %43 : vector<2x96xf32>
    %cst_22 = arith.constant 1.000000e+00 : f32
    %45 = vector.broadcast %cst_22 : f32 to vector<2x96xf32>
    %46 = arith.addf %45, %44 : vector<2x96xf32>
    %47 = arith.divf %45, %46 : vector<2x96xf32>
    %48 = vector.extract_strided_slice %41 {offsets = [0, 96], sizes = [2, 32], strides = [1, 1]} : vector<2x128xf32> to vector<2x32xf32>
    %49 = math.tanh %48 : vector<2x32xf32>
    %50 = vector.extract_strided_slice %47 {offsets = [0, 0], sizes = [2, 32], strides = [1, 1]} : vector<2x96xf32> to vector<2x32xf32>
    %51 = vector.extract_strided_slice %47 {offsets = [0, 32], sizes = [2, 32], strides = [1, 1]} : vector<2x96xf32> to vector<2x32xf32>
    %52 = vector.extract_strided_slice %47 {offsets = [0, 64], sizes = [2, 32], strides = [1, 1]} : vector<2x96xf32> to vector<2x32xf32>
    %53 = arith.mulf %51, %12 : vector<2x32xf32>
    %54 = arith.mulf %50, %49 : vector<2x32xf32>
    %55 = arith.addf %53, %54 : vector<2x32xf32>
    %56 = math.tanh %55 : vector<2x32xf32>
    %57 = arith.mulf %52, %56 : vector<2x32xf32>
    %58 = arith.index_cast %c0_i32_16 : i32 to index
    %c0_23 = arith.constant 0 : index
    %c0_24 = arith.constant 0 : index
    %59 = vector.load %arg7[%58, %c0_23, %c0_24] : memref<8x2x32xf32, #tpu.memory_space<vmem>>, vector<1x2x32xf32>
    %60 = vector.shape_cast %59 : vector<1x2x32xf32> to vector<2x32xf32>
    %61 = vector.shape_cast %57 : vector<2x32xf32> to vector<1x2x32xf32>
    tpu.vector_store %arg7[%58, %c0_23, %c0_24], %61 {strides = array<i32>} : memref<8x2x32xf32, #tpu.memory_space<vmem>>, vector<1x2x32xf32>,
    %c1_i32 = arith.constant 1 : i32
    %62 = arith.index_cast %c1_i32 : i32 to index
    %c0_25 = arith.constant 0 : index
    %c0_26 = arith.constant 0 : index
    %63 = vector.load %arg2[%62, %c0_25, %c0_26] : memref<8x2x128xbf16, #tpu.memory_space<vmem>>, vector<1x2x128xbf16>
    %64 = vector.shape_cast %63 : vector<1x2x128xbf16> to vector<2x128xbf16>
    %65 = arith.extf %64 : vector<2x128xbf16> to vector<2x128xf32>
    %66 = arith.truncf %35 : vector<2x32xf32> to vector<2x32xbf16>
    %cst_27 = arith.constant dense<0.000000e+00> : vector<2x128xf32>
    %67 = tpu.matmul %66, %3, %cst_27 {dimension_numbers = #tpu.dot_dimension_numbers<[1], [0], [0], [1], [0, 0, 1, 1], [], []>} : vector<2x32xbf16>, vector<32x128xbf16>, vector<2x128xf32> -> vector<2x128xf32>
    %68 = arith.addf %65, %67 : vector<2x128xf32>
    %69 = vector.extract_strided_slice %68 {offsets = [0, 0], sizes = [2, 96], strides = [1, 1]} : vector<2x128xf32> to vector<2x96xf32>
    %70 = arith.negf %69 : vector<2x96xf32>
    %71 = math.exp %70 : vector<2x96xf32>
    %cst_28 = arith.constant 1.000000e+00 : f32
    %72 = vector.broadcast %cst_28 : f32 to vector<2x96xf32>
    %73 = arith.addf %72, %71 : vector<2x96xf32>
    %74 = arith.divf %72, %73 : vector<2x96xf32>
    %75 = vector.extract_strided_slice %68 {offsets = [0, 96], sizes = [2, 32], strides = [1, 1]} : vector<2x128xf32> to vector<2x32xf32>
    %76 = math.tanh %75 : vector<2x32xf32>
    %77 = vector.extract_strided_slice %74 {offsets = [0, 0], sizes = [2, 32], strides = [1, 1]} : vector<2x96xf32> to vector<2x32xf32>
    %78 = vector.extract_strided_slice %74 {offsets = [0, 32], sizes = [2, 32], strides = [1, 1]} : vector<2x96xf32> to vector<2x32xf32>
    %79 = vector.extract_strided_slice %74 {offsets = [0, 64], sizes = [2, 32], strides = [1, 1]} : vector<2x96xf32> to vector<2x32xf32>
    %80 = arith.mulf %78, %33 : vector<2x32xf32>
    %81 = arith.mulf %77, %76 : vector<2x32xf32>
    %82 = arith.addf %80, %81 : vector<2x32xf32>
    %83 = math.tanh %82 : vector<2x32xf32>
    %84 = arith.mulf %79, %83 : vector<2x32xf32>
    %85 = arith.truncf %84 : vector<2x32xf32> to vector<2x32xbf16>
    %cst_29 = arith.constant dense<0.000000e+00> : vector<2x128xf32>
    %86 = tpu.matmul %85, %4, %cst_29 {dimension_numbers = #tpu.dot_dimension_numbers<[1], [0], [0], [1], [0, 0, 1, 1], [], []>} : vector<2x32xbf16>, vector<32x128xbf16>, vector<2x128xf32> -> vector<2x128xf32>
    %87 = arith.truncf %57 : vector<2x32xf32> to vector<2x32xbf16>
    %cst_30 = arith.constant dense<0.000000e+00> : vector<2x128xf32>
    %88 = tpu.matmul %87, %5, %cst_30 {dimension_numbers = #tpu.dot_dimension_numbers<[1], [0], [0], [1], [0, 0, 1, 1], [], []>} : vector<2x32xbf16>, vector<32x128xbf16>, vector<2x128xf32> -> vector<2x128xf32>
    %89 = arith.addf %86, %88 : vector<2x128xf32>
    %90 = arith.addf %89, %8 : vector<2x128xf32>
    %91 = vector.extract_strided_slice %90 {offsets = [0, 0], sizes = [2, 96], strides = [1, 1]} : vector<2x128xf32> to vector<2x96xf32>
    %92 = arith.negf %91 : vector<2x96xf32>
    %93 = math.exp %92 : vector<2x96xf32>
    %cst_31 = arith.constant 1.000000e+00 : f32
    %94 = vector.broadcast %cst_31 : f32 to vector<2x96xf32>
    %95 = arith.addf %94, %93 : vector<2x96xf32>
    %96 = arith.divf %94, %95 : vector<2x96xf32>
    %97 = vector.extract_strided_slice %90 {offsets = [0, 96], sizes = [2, 32], strides = [1, 1]} : vector<2x128xf32> to vector<2x32xf32>
    %98 = math.tanh %97 : vector<2x32xf32>
    %99 = vector.extract_strided_slice %96 {offsets = [0, 0], sizes = [2, 32], strides = [1, 1]} : vector<2x96xf32> to vector<2x32xf32>
    %100 = vector.extract_strided_slice %96 {offsets = [0, 32], sizes = [2, 32], strides = [1, 1]} : vector<2x96xf32> to vector<2x32xf32>
    %101 = vector.extract_strided_slice %96 {offsets = [0, 64], sizes = [2, 32], strides = [1, 1]} : vector<2x96xf32> to vector<2x32xf32>
    %102 = arith.mulf %100, %55 : vector<2x32xf32>
    %103 = arith.mulf %99, %98 : vector<2x32xf32>
    %104 = arith.addf %102, %103 : vector<2x32xf32>
    %105 = math.tanh %104 : vector<2x32xf32>
    %106 = arith.mulf %101, %105 : vector<2x32xf32>
    %107 = arith.index_cast %c1_i32 : i32 to index
    %c0_32 = arith.constant 0 : index
    %c0_33 = arith.constant 0 : index
    %108 = vector.load %arg7[%107, %c0_32, %c0_33] : memref<8x2x32xf32, #tpu.memory_space<vmem>>, vector<1x2x32xf32>
    %109 = vector.shape_cast %108 : vector<1x2x32xf32> to vector<2x32xf32>
    %110 = vector.shape_cast %106 : vector<2x32xf32> to vector<1x2x32xf32>
    tpu.vector_store %arg7[%107, %c0_32, %c0_33], %110 {strides = array<i32>} : memref<8x2x32xf32, #tpu.memory_space<vmem>>, vector<1x2x32xf32>,
    %c2_i32 = arith.constant 2 : i32
    %111 = arith.index_cast %c2_i32 : i32 to index
    %c0_34 = arith.constant 0 : index
    %c0_35 = arith.constant 0 : index
    %112 = vector.load %arg2[%111, %c0_34, %c0_35] : memref<8x2x128xbf16, #tpu.memory_space<vmem>>, vector<1x2x128xbf16>
    %113 = vector.shape_cast %112 : vector<1x2x128xbf16> to vector<2x128xbf16>
    %114 = arith.extf %113 : vector<2x128xbf16> to vector<2x128xf32>
    %115 = arith.truncf %84 : vector<2x32xf32> to vector<2x32xbf16>
    %cst_36 = arith.constant dense<0.000000e+00> : vector<2x128xf32>
    %116 = tpu.matmul %115, %3, %cst_36 {dimension_numbers = #tpu.dot_dimension_numbers<[1], [0], [0], [1], [0, 0, 1, 1], [], []>} : vector<2x32xbf16>, vector<32x128xbf16>, vector<2x128xf32> -> vector<2x128xf32>
    %117 = arith.addf %114, %116 : vector<2x128xf32>
    %118 = vector.extract_strided_slice %117 {offsets = [0, 0], sizes = [2, 96], strides = [1, 1]} : vector<2x128xf32> to vector<2x96xf32>
    %119 = arith.negf %118 : vector<2x96xf32>
    %120 = math.exp %119 : vector<2x96xf32>
    %cst_37 = arith.constant 1.000000e+00 : f32
    %121 = vector.broadcast %cst_37 : f32 to vector<2x96xf32>
    %122 = arith.addf %121, %120 : vector<2x96xf32>
    %123 = arith.divf %121, %122 : vector<2x96xf32>
    %124 = vector.extract_strided_slice %117 {offsets = [0, 96], sizes = [2, 32], strides = [1, 1]} : vector<2x128xf32> to vector<2x32xf32>
    %125 = math.tanh %124 : vector<2x32xf32>
    %126 = vector.extract_strided_slice %123 {offsets = [0, 0], sizes = [2, 32], strides = [1, 1]} : vector<2x96xf32> to vector<2x32xf32>
    %127 = vector.extract_strided_slice %123 {offsets = [0, 32], sizes = [2, 32], strides = [1, 1]} : vector<2x96xf32> to vector<2x32xf32>
    %128 = vector.extract_strided_slice %123 {offsets = [0, 64], sizes = [2, 32], strides = [1, 1]} : vector<2x96xf32> to vector<2x32xf32>
    %129 = arith.mulf %127, %82 : vector<2x32xf32>
    %130 = arith.mulf %126, %125 : vector<2x32xf32>
    %131 = arith.addf %129, %130 : vector<2x32xf32>
    %132 = math.tanh %131 : vector<2x32xf32>
    %133 = arith.mulf %128, %132 : vector<2x32xf32>
    %134 = arith.truncf %133 : vector<2x32xf32> to vector<2x32xbf16>
    %cst_38 = arith.constant dense<0.000000e+00> : vector<2x128xf32>
    %135 = tpu.matmul %134, %4, %cst_38 {dimension_numbers = #tpu.dot_dimension_numbers<[1], [0], [0], [1], [0, 0, 1, 1], [], []>} : vector<2x32xbf16>, vector<32x128xbf16>, vector<2x128xf32> -> vector<2x128xf32>
    %136 = arith.truncf %106 : vector<2x32xf32> to vector<2x32xbf16>
    %cst_39 = arith.constant dense<0.000000e+00> : vector<2x128xf32>
    %137 = tpu.matmul %136, %5, %cst_39 {dimension_numbers = #tpu.dot_dimension_numbers<[1], [0], [0], [1], [0, 0, 1, 1], [], []>} : vector<2x32xbf16>, vector<32x128xbf16>, vector<2x128xf32> -> vector<2x128xf32>
    %138 = arith.addf %135, %137 : vector<2x128xf32>
    %139 = arith.addf %138, %8 : vector<2x128xf32>
    %140 = vector.extract_strided_slice %139 {offsets = [0, 0], sizes = [2, 96], strides = [1, 1]} : vector<2x128xf32> to vector<2x96xf32>
    %141 = arith.negf %140 : vector<2x96xf32>
    %142 = math.exp %141 : vector<2x96xf32>
    %cst_40 = arith.constant 1.000000e+00 : f32
    %143 = vector.broadcast %cst_40 : f32 to vector<2x96xf32>
    %144 = arith.addf %143, %142 : vector<2x96xf32>
    %145 = arith.divf %143, %144 : vector<2x96xf32>
    %146 = vector.extract_strided_slice %139 {offsets = [0, 96], sizes = [2, 32], strides = [1, 1]} : vector<2x128xf32> to vector<2x32xf32>
    %147 = math.tanh %146 : vector<2x32xf32>
    %148 = vector.extract_strided_slice %145 {offsets = [0, 0], sizes = [2, 32], strides = [1, 1]} : vector<2x96xf32> to vector<2x32xf32>
    %149 = vector.extract_strided_slice %145 {offsets = [0, 32], sizes = [2, 32], strides = [1, 1]} : vector<2x96xf32> to vector<2x32xf32>
    %150 = vector.extract_strided_slice %145 {offsets = [0, 64], sizes = [2, 32], strides = [1, 1]} : vector<2x96xf32> to vector<2x32xf32>
    %151 = arith.mulf %149, %104 : vector<2x32xf32>
    %152 = arith.mulf %148, %147 : vector<2x32xf32>
    %153 = arith.addf %151, %152 : vector<2x32xf32>
    %154 = math.tanh %153 : vector<2x32xf32>
    %155 = arith.mulf %150, %154 : vector<2x32xf32>
    %156 = arith.index_cast %c2_i32 : i32 to index
    %c0_41 = arith.constant 0 : index
    %c0_42 = arith.constant 0 : index
    %157 = vector.load %arg7[%156, %c0_41, %c0_42] : memref<8x2x32xf32, #tpu.memory_space<vmem>>, vector<1x2x32xf32>
    %158 = vector.shape_cast %157 : vector<1x2x32xf32> to vector<2x32xf32>
    %159 = vector.shape_cast %155 : vector<2x32xf32> to vector<1x2x32xf32>
    tpu.vector_store %arg7[%156, %c0_41, %c0_42], %159 {strides = array<i32>} : memref<8x2x32xf32, #tpu.memory_space<vmem>>, vector<1x2x32xf32>,
    %c3_i32 = arith.constant 3 : i32
    %160 = arith.index_cast %c3_i32 : i32 to index
    %c0_43 = arith.constant 0 : index
    %c0_44 = arith.constant 0 : index
    %161 = vector.load %arg2[%160, %c0_43, %c0_44] : memref<8x2x128xbf16, #tpu.memory_space<vmem>>, vector<1x2x128xbf16>
    %162 = vector.shape_cast %161 : vector<1x2x128xbf16> to vector<2x128xbf16>
    %163 = arith.extf %162 : vector<2x128xbf16> to vector<2x128xf32>
    %164 = arith.truncf %133 : vector<2x32xf32> to vector<2x32xbf16>
    %cst_45 = arith.constant dense<0.000000e+00> : vector<2x128xf32>
    %165 = tpu.matmul %164, %3, %cst_45 {dimension_numbers = #tpu.dot_dimension_numbers<[1], [0], [0], [1], [0, 0, 1, 1], [], []>} : vector<2x32xbf16>, vector<32x128xbf16>, vector<2x128xf32> -> vector<2x128xf32>
    %166 = arith.addf %163, %165 : vector<2x128xf32>
    %167 = vector.extract_strided_slice %166 {offsets = [0, 0], sizes = [2, 96], strides = [1, 1]} : vector<2x128xf32> to vector<2x96xf32>
    %168 = arith.negf %167 : vector<2x96xf32>
    %169 = math.exp %168 : vector<2x96xf32>
    %cst_46 = arith.constant 1.000000e+00 : f32
    %170 = vector.broadcast %cst_46 : f32 to vector<2x96xf32>
    %171 = arith.addf %170, %169 : vector<2x96xf32>
    %172 = arith.divf %170, %171 : vector<2x96xf32>
    %173 = vector.extract_strided_slice %166 {offsets = [0, 96], sizes = [2, 32], strides = [1, 1]} : vector<2x128xf32> to vector<2x32xf32>
    %174 = math.tanh %173 : vector<2x32xf32>
    %175 = vector.extract_strided_slice %172 {offsets = [0, 0], sizes = [2, 32], strides = [1, 1]} : vector<2x96xf32> to vector<2x32xf32>
    %176 = vector.extract_strided_slice %172 {offsets = [0, 32], sizes = [2, 32], strides = [1, 1]} : vector<2x96xf32> to vector<2x32xf32>
    %177 = vector.extract_strided_slice %172 {offsets = [0, 64], sizes = [2, 32], strides = [1, 1]} : vector<2x96xf32> to vector<2x32xf32>
    %178 = arith.mulf %176, %131 : vector<2x32xf32>
    %179 = arith.mulf %175, %174 : vector<2x32xf32>
    %180 = arith.addf %178, %179 : vector<2x32xf32>
    %181 = math.tanh %180 : vector<2x32xf32>
    %182 = arith.mulf %177, %181 : vector<2x32xf32>
    %183 = arith.truncf %182 : vector<2x32xf32> to vector<2x32xbf16>
    %cst_47 = arith.constant dense<0.000000e+00> : vector<2x128xf32>
    %184 = tpu.matmul %183, %4, %cst_47 {dimension_numbers = #tpu.dot_dimension_numbers<[1], [0], [0], [1], [0, 0, 1, 1], [], []>} : vector<2x32xbf16>, vector<32x128xbf16>, vector<2x128xf32> -> vector<2x128xf32>
    %185 = arith.truncf %155 : vector<2x32xf32> to vector<2x32xbf16>
    %cst_48 = arith.constant dense<0.000000e+00> : vector<2x128xf32>
    %186 = tpu.matmul %185, %5, %cst_48 {dimension_numbers = #tpu.dot_dimension_numbers<[1], [0], [0], [1], [0, 0, 1, 1], [], []>} : vector<2x32xbf16>, vector<32x128xbf16>, vector<2x128xf32> -> vector<2x128xf32>
    %187 = arith.addf %184, %186 : vector<2x128xf32>
    %188 = arith.addf %187, %8 : vector<2x128xf32>
    %189 = vector.extract_strided_slice %188 {offsets = [0, 0], sizes = [2, 96], strides = [1, 1]} : vector<2x128xf32> to vector<2x96xf32>
    %190 = arith.negf %189 : vector<2x96xf32>
    %191 = math.exp %190 : vector<2x96xf32>
    %cst_49 = arith.constant 1.000000e+00 : f32
    %192 = vector.broadcast %cst_49 : f32 to vector<2x96xf32>
    %193 = arith.addf %192, %191 : vector<2x96xf32>
    %194 = arith.divf %192, %193 : vector<2x96xf32>
    %195 = vector.extract_strided_slice %188 {offsets = [0, 96], sizes = [2, 32], strides = [1, 1]} : vector<2x128xf32> to vector<2x32xf32>
    %196 = math.tanh %195 : vector<2x32xf32>
    %197 = vector.extract_strided_slice %194 {offsets = [0, 0], sizes = [2, 32], strides = [1, 1]} : vector<2x96xf32> to vector<2x32xf32>
    %198 = vector.extract_strided_slice %194 {offsets = [0, 32], sizes = [2, 32], strides = [1, 1]} : vector<2x96xf32> to vector<2x32xf32>
    %199 = vector.extract_strided_slice %194 {offsets = [0, 64], sizes = [2, 32], strides = [1, 1]} : vector<2x96xf32> to vector<2x32xf32>
    %200 = arith.mulf %198, %153 : vector<2x32xf32>
    %201 = arith.mulf %197, %196 : vector<2x32xf32>
    %202 = arith.addf %200, %201 : vector<2x32xf32>
    %203 = math.tanh %202 : vector<2x32xf32>
    %204 = arith.mulf %199, %203 : vector<2x32xf32>
    %205 = arith.index_cast %c3_i32 : i32 to index
    %c0_50 = arith.constant 0 : index
    %c0_51 = arith.constant 0 : index
    %206 = vector.load %arg7[%205, %c0_50, %c0_51] : memref<8x2x32xf32, #tpu.memory_space<vmem>>, vector<1x2x32xf32>
    %207 = vector.shape_cast %206 : vector<1x2x32xf32> to vector<2x32xf32>
    %208 = vector.shape_cast %204 : vector<2x32xf32> to vector<1x2x32xf32>
    tpu.vector_store %arg7[%205, %c0_50, %c0_51], %208 {strides = array<i32>} : memref<8x2x32xf32, #tpu.memory_space<vmem>>, vector<1x2x32xf32>,
    %c4_i32 = arith.constant 4 : i32
    %209 = arith.index_cast %c4_i32 : i32 to index
    %c0_52 = arith.constant 0 : index
    %c0_53 = arith.constant 0 : index
    %210 = vector.load %arg2[%209, %c0_52, %c0_53] : memref<8x2x128xbf16, #tpu.memory_space<vmem>>, vector<1x2x128xbf16>
    %211 = vector.shape_cast %210 : vector<1x2x128xbf16> to vector<2x128xbf16>
    %212 = arith.extf %211 : vector<2x128xbf16> to vector<2x128xf32>
    %213 = arith.truncf %182 : vector<2x32xf32> to vector<2x32xbf16>
    %cst_54 = arith.constant dense<0.000000e+00> : vector<2x128xf32>
    %214 = tpu.matmul %213, %3, %cst_54 {dimension_numbers = #tpu.dot_dimension_numbers<[1], [0], [0], [1], [0, 0, 1, 1], [], []>} : vector<2x32xbf16>, vector<32x128xbf16>, vector<2x128xf32> -> vector<2x128xf32>
    %215 = arith.addf %212, %214 : vector<2x128xf32>
    %216 = vector.extract_strided_slice %215 {offsets = [0, 0], sizes = [2, 96], strides = [1, 1]} : vector<2x128xf32> to vector<2x96xf32>
    %217 = arith.negf %216 : vector<2x96xf32>
    %218 = math.exp %217 : vector<2x96xf32>
    %cst_55 = arith.constant 1.000000e+00 : f32
    %219 = vector.broadcast %cst_55 : f32 to vector<2x96xf32>
    %220 = arith.addf %219, %218 : vector<2x96xf32>
    %221 = arith.divf %219, %220 : vector<2x96xf32>
    %222 = vector.extract_strided_slice %215 {offsets = [0, 96], sizes = [2, 32], strides = [1, 1]} : vector<2x128xf32> to vector<2x32xf32>
    %223 = math.tanh %222 : vector<2x32xf32>
    %224 = vector.extract_strided_slice %221 {offsets = [0, 0], sizes = [2, 32], strides = [1, 1]} : vector<2x96xf32> to vector<2x32xf32>
    %225 = vector.extract_strided_slice %221 {offsets = [0, 32], sizes = [2, 32], strides = [1, 1]} : vector<2x96xf32> to vector<2x32xf32>
    %226 = vector.extract_strided_slice %221 {offsets = [0, 64], sizes = [2, 32], strides = [1, 1]} : vector<2x96xf32> to vector<2x32xf32>
    %227 = arith.mulf %225, %180 : vector<2x32xf32>
    %228 = arith.mulf %224, %223 : vector<2x32xf32>
    %229 = arith.addf %227, %228 : vector<2x32xf32>
    %230 = math.tanh %229 : vector<2x32xf32>
    %231 = arith.mulf %226, %230 : vector<2x32xf32>
    %232 = arith.truncf %231 : vector<2x32xf32> to vector<2x32xbf16>
    %cst_56 = arith.constant dense<0.000000e+00> : vector<2x128xf32>
    %233 = tpu.matmul %232, %4, %cst_56 {dimension_numbers = #tpu.dot_dimension_numbers<[1], [0], [0], [1], [0, 0, 1, 1], [], []>} : vector<2x32xbf16>, vector<32x128xbf16>, vector<2x128xf32> -> vector<2x128xf32>
    %234 = arith.truncf %204 : vector<2x32xf32> to vector<2x32xbf16>
    %cst_57 = arith.constant dense<0.000000e+00> : vector<2x128xf32>
    %235 = tpu.matmul %234, %5, %cst_57 {dimension_numbers = #tpu.dot_dimension_numbers<[1], [0], [0], [1], [0, 0, 1, 1], [], []>} : vector<2x32xbf16>, vector<32x128xbf16>, vector<2x128xf32> -> vector<2x128xf32>
    %236 = arith.addf %233, %235 : vector<2x128xf32>
    %237 = arith.addf %236, %8 : vector<2x128xf32>
    %238 = vector.extract_strided_slice %237 {offsets = [0, 0], sizes = [2, 96], strides = [1, 1]} : vector<2x128xf32> to vector<2x96xf32>
    %239 = arith.negf %238 : vector<2x96xf32>
    %240 = math.exp %239 : vector<2x96xf32>
    %cst_58 = arith.constant 1.000000e+00 : f32
    %241 = vector.broadcast %cst_58 : f32 to vector<2x96xf32>
    %242 = arith.addf %241, %240 : vector<2x96xf32>
    %243 = arith.divf %241, %242 : vector<2x96xf32>
    %244 = vector.extract_strided_slice %237 {offsets = [0, 96], sizes = [2, 32], strides = [1, 1]} : vector<2x128xf32> to vector<2x32xf32>
    %245 = math.tanh %244 : vector<2x32xf32>
    %246 = vector.extract_strided_slice %243 {offsets = [0, 0], sizes = [2, 32], strides = [1, 1]} : vector<2x96xf32> to vector<2x32xf32>
    %247 = vector.extract_strided_slice %243 {offsets = [0, 32], sizes = [2, 32], strides = [1, 1]} : vector<2x96xf32> to vector<2x32xf32>
    %248 = vector.extract_strided_slice %243 {offsets = [0, 64], sizes = [2, 32], strides = [1, 1]} : vector<2x96xf32> to vector<2x32xf32>
    %249 = arith.mulf %247, %202 : vector<2x32xf32>
    %250 = arith.mulf %246, %245 : vector<2x32xf32>
    %251 = arith.addf %249, %250 : vector<2x32xf32>
    %252 = math.tanh %251 : vector<2x32xf32>
    %253 = arith.mulf %248, %252 : vector<2x32xf32>
    %254 = arith.index_cast %c4_i32 : i32 to index
    %c0_59 = arith.constant 0 : index
    %c0_60 = arith.constant 0 : index
    %255 = vector.load %arg7[%254, %c0_59, %c0_60] : memref<8x2x32xf32, #tpu.memory_space<vmem>>, vector<1x2x32xf32>
    %256 = vector.shape_cast %255 : vector<1x2x32xf32> to vector<2x32xf32>
    %257 = vector.shape_cast %253 : vector<2x32xf32> to vector<1x2x32xf32>
    tpu.vector_store %arg7[%254, %c0_59, %c0_60], %257 {strides = array<i32>} : memref<8x2x32xf32, #tpu.memory_space<vmem>>, vector<1x2x32xf32>,
    %c5_i32 = arith.constant 5 : i32
    %258 = arith.index_cast %c5_i32 : i32 to index
    %c0_61 = arith.constant 0 : index
    %c0_62 = arith.constant 0 : index
    %259 = vector.load %arg2[%258, %c0_61, %c0_62] : memref<8x2x128xbf16, #tpu.memory_space<vmem>>, vector<1x2x128xbf16>
    %260 = vector.shape_cast %259 : vector<1x2x128xbf16> to vector<2x128xbf16>
    %261 = arith.extf %260 : vector<2x128xbf16> to vector<2x128xf32>
    %262 = arith.truncf %231 : vector<2x32xf32> to vector<2x32xbf16>
    %cst_63 = arith.constant dense<0.000000e+00> : vector<2x128xf32>
    %263 = tpu.matmul %262, %3, %cst_63 {dimension_numbers = #tpu.dot_dimension_numbers<[1], [0], [0], [1], [0, 0, 1, 1], [], []>} : vector<2x32xbf16>, vector<32x128xbf16>, vector<2x128xf32> -> vector<2x128xf32>
    %264 = arith.addf %261, %263 : vector<2x128xf32>
    %265 = vector.extract_strided_slice %264 {offsets = [0, 0], sizes = [2, 96], strides = [1, 1]} : vector<2x128xf32> to vector<2x96xf32>
    %266 = arith.negf %265 : vector<2x96xf32>
    %267 = math.exp %266 : vector<2x96xf32>
    %cst_64 = arith.constant 1.000000e+00 : f32
    %268 = vector.broadcast %cst_64 : f32 to vector<2x96xf32>
    %269 = arith.addf %268, %267 : vector<2x96xf32>
    %270 = arith.divf %268, %269 : vector<2x96xf32>
    %271 = vector.extract_strided_slice %264 {offsets = [0, 96], sizes = [2, 32], strides = [1, 1]} : vector<2x128xf32> to vector<2x32xf32>
    %272 = math.tanh %271 : vector<2x32xf32>
    %273 = vector.extract_strided_slice %270 {offsets = [0, 0], sizes = [2, 32], strides = [1, 1]} : vector<2x96xf32> to vector<2x32xf32>
    %274 = vector.extract_strided_slice %270 {offsets = [0, 32], sizes = [2, 32], strides = [1, 1]} : vector<2x96xf32> to vector<2x32xf32>
    %275 = vector.extract_strided_slice %270 {offsets = [0, 64], sizes = [2, 32], strides = [1, 1]} : vector<2x96xf32> to vector<2x32xf32>
    %276 = arith.mulf %274, %229 : vector<2x32xf32>
    %277 = arith.mulf %273, %272 : vector<2x32xf32>
    %278 = arith.addf %276, %277 : vector<2x32xf32>
    %279 = math.tanh %278 : vector<2x32xf32>
    %280 = arith.mulf %275, %279 : vector<2x32xf32>
    %281 = arith.truncf %280 : vector<2x32xf32> to vector<2x32xbf16>
    %cst_65 = arith.constant dense<0.000000e+00> : vector<2x128xf32>
    %282 = tpu.matmul %281, %4, %cst_65 {dimension_numbers = #tpu.dot_dimension_numbers<[1], [0], [0], [1], [0, 0, 1, 1], [], []>} : vector<2x32xbf16>, vector<32x128xbf16>, vector<2x128xf32> -> vector<2x128xf32>
    %283 = arith.truncf %253 : vector<2x32xf32> to vector<2x32xbf16>
    %cst_66 = arith.constant dense<0.000000e+00> : vector<2x128xf32>
    %284 = tpu.matmul %283, %5, %cst_66 {dimension_numbers = #tpu.dot_dimension_numbers<[1], [0], [0], [1], [0, 0, 1, 1], [], []>} : vector<2x32xbf16>, vector<32x128xbf16>, vector<2x128xf32> -> vector<2x128xf32>
    %285 = arith.addf %282, %284 : vector<2x128xf32>
    %286 = arith.addf %285, %8 : vector<2x128xf32>
    %287 = vector.extract_strided_slice %286 {offsets = [0, 0], sizes = [2, 96], strides = [1, 1]} : vector<2x128xf32> to vector<2x96xf32>
    %288 = arith.negf %287 : vector<2x96xf32>
    %289 = math.exp %288 : vector<2x96xf32>
    %cst_67 = arith.constant 1.000000e+00 : f32
    %290 = vector.broadcast %cst_67 : f32 to vector<2x96xf32>
    %291 = arith.addf %290, %289 : vector<2x96xf32>
    %292 = arith.divf %290, %291 : vector<2x96xf32>
    %293 = vector.extract_strided_slice %286 {offsets = [0, 96], sizes = [2, 32], strides = [1, 1]} : vector<2x128xf32> to vector<2x32xf32>
    %294 = math.tanh %293 : vector<2x32xf32>
    %295 = vector.extract_strided_slice %292 {offsets = [0, 0], sizes = [2, 32], strides = [1, 1]} : vector<2x96xf32> to vector<2x32xf32>
    %296 = vector.extract_strided_slice %292 {offsets = [0, 32], sizes = [2, 32], strides = [1, 1]} : vector<2x96xf32> to vector<2x32xf32>
    %297 = vector.extract_strided_slice %292 {offsets = [0, 64], sizes = [2, 32], strides = [1, 1]} : vector<2x96xf32> to vector<2x32xf32>
    %298 = arith.mulf %296, %251 : vector<2x32xf32>
    %299 = arith.mulf %295, %294 : vector<2x32xf32>
    %300 = arith.addf %298, %299 : vector<2x32xf32>
    %301 = math.tanh %300 : vector<2x32xf32>
    %302 = arith.mulf %297, %301 : vector<2x32xf32>
    %303 = arith.index_cast %c5_i32 : i32 to index
    %c0_68 = arith.constant 0 : index
    %c0_69 = arith.constant 0 : index
    %304 = vector.load %arg7[%303, %c0_68, %c0_69] : memref<8x2x32xf32, #tpu.memory_space<vmem>>, vector<1x2x32xf32>
    %305 = vector.shape_cast %304 : vector<1x2x32xf32> to vector<2x32xf32>
    %306 = vector.shape_cast %302 : vector<2x32xf32> to vector<1x2x32xf32>
    tpu.vector_store %arg7[%303, %c0_68, %c0_69], %306 {strides = array<i32>} : memref<8x2x32xf32, #tpu.memory_space<vmem>>, vector<1x2x32xf32>,
    %c6_i32 = arith.constant 6 : i32
    %307 = arith.index_cast %c6_i32 : i32 to index
    %c0_70 = arith.constant 0 : index
    %c0_71 = arith.constant 0 : index
    %308 = vector.load %arg2[%307, %c0_70, %c0_71] : memref<8x2x128xbf16, #tpu.memory_space<vmem>>, vector<1x2x128xbf16>
    %309 = vector.shape_cast %308 : vector<1x2x128xbf16> to vector<2x128xbf16>
    %310 = arith.extf %309 : vector<2x128xbf16> to vector<2x128xf32>
    %311 = arith.truncf %280 : vector<2x32xf32> to vector<2x32xbf16>
    %cst_72 = arith.constant dense<0.000000e+00> : vector<2x128xf32>
    %312 = tpu.matmul %311, %3, %cst_72 {dimension_numbers = #tpu.dot_dimension_numbers<[1], [0], [0], [1], [0, 0, 1, 1], [], []>} : vector<2x32xbf16>, vector<32x128xbf16>, vector<2x128xf32> -> vector<2x128xf32>
    %313 = arith.addf %310, %312 : vector<2x128xf32>
    %314 = vector.extract_strided_slice %313 {offsets = [0, 0], sizes = [2, 96], strides = [1, 1]} : vector<2x128xf32> to vector<2x96xf32>
    %315 = arith.negf %314 : vector<2x96xf32>
    %316 = math.exp %315 : vector<2x96xf32>
    %cst_73 = arith.constant 1.000000e+00 : f32
    %317 = vector.broadcast %cst_73 : f32 to vector<2x96xf32>
    %318 = arith.addf %317, %316 : vector<2x96xf32>
    %319 = arith.divf %317, %318 : vector<2x96xf32>
    %320 = vector.extract_strided_slice %313 {offsets = [0, 96], sizes = [2, 32], strides = [1, 1]} : vector<2x128xf32> to vector<2x32xf32>
    %321 = math.tanh %320 : vector<2x32xf32>
    %322 = vector.extract_strided_slice %319 {offsets = [0, 0], sizes = [2, 32], strides = [1, 1]} : vector<2x96xf32> to vector<2x32xf32>
    %323 = vector.extract_strided_slice %319 {offsets = [0, 32], sizes = [2, 32], strides = [1, 1]} : vector<2x96xf32> to vector<2x32xf32>
    %324 = vector.extract_strided_slice %319 {offsets = [0, 64], sizes = [2, 32], strides = [1, 1]} : vector<2x96xf32> to vector<2x32xf32>
    %325 = arith.mulf %323, %278 : vector<2x32xf32>
    %326 = arith.mulf %322, %321 : vector<2x32xf32>
    %327 = arith.addf %325, %326 : vector<2x32xf32>
    %328 = math.tanh %327 : vector<2x32xf32>
    %329 = arith.mulf %324, %328 : vector<2x32xf32>
    %330 = arith.truncf %329 : vector<2x32xf32> to vector<2x32xbf16>
    %cst_74 = arith.constant dense<0.000000e+00> : vector<2x128xf32>
    %331 = tpu.matmul %330, %4, %cst_74 {dimension_numbers = #tpu.dot_dimension_numbers<[1], [0], [0], [1], [0, 0, 1, 1], [], []>} : vector<2x32xbf16>, vector<32x128xbf16>, vector<2x128xf32> -> vector<2x128xf32>
    %332 = arith.truncf %302 : vector<2x32xf32> to vector<2x32xbf16>
    %cst_75 = arith.constant dense<0.000000e+00> : vector<2x128xf32>
    %333 = tpu.matmul %332, %5, %cst_75 {dimension_numbers = #tpu.dot_dimension_numbers<[1], [0], [0], [1], [0, 0, 1, 1], [], []>} : vector<2x32xbf16>, vector<32x128xbf16>, vector<2x128xf32> -> vector<2x128xf32>
    %334 = arith.addf %331, %333 : vector<2x128xf32>
    %335 = arith.addf %334, %8 : vector<2x128xf32>
    %336 = vector.extract_strided_slice %335 {offsets = [0, 0], sizes = [2, 96], strides = [1, 1]} : vector<2x128xf32> to vector<2x96xf32>
    %337 = arith.negf %336 : vector<2x96xf32>
    %338 = math.exp %337 : vector<2x96xf32>
    %cst_76 = arith.constant 1.000000e+00 : f32
    %339 = vector.broadcast %cst_76 : f32 to vector<2x96xf32>
    %340 = arith.addf %339, %338 : vector<2x96xf32>
    %341 = arith.divf %339, %340 : vector<2x96xf32>
    %342 = vector.extract_strided_slice %335 {offsets = [0, 96], sizes = [2, 32], strides = [1, 1]} : vector<2x128xf32> to vector<2x32xf32>
    %343 = math.tanh %342 : vector<2x32xf32>
    %344 = vector.extract_strided_slice %341 {offsets = [0, 0], sizes = [2, 32], strides = [1, 1]} : vector<2x96xf32> to vector<2x32xf32>
    %345 = vector.extract_strided_slice %341 {offsets = [0, 32], sizes = [2, 32], strides = [1, 1]} : vector<2x96xf32> to vector<2x32xf32>
    %346 = vector.extract_strided_slice %341 {offsets = [0, 64], sizes = [2, 32], strides = [1, 1]} : vector<2x96xf32> to vector<2x32xf32>
    %347 = arith.mulf %345, %300 : vector<2x32xf32>
    %348 = arith.mulf %344, %343 : vector<2x32xf32>
    %349 = arith.addf %347, %348 : vector<2x32xf32>
    %350 = math.tanh %349 : vector<2x32xf32>
    %351 = arith.mulf %346, %350 : vector<2x32xf32>
    %352 = arith.index_cast %c6_i32 : i32 to index
    %c0_77 = arith.constant 0 : index
    %c0_78 = arith.constant 0 : index
    %353 = vector.load %arg7[%352, %c0_77, %c0_78] : memref<8x2x32xf32, #tpu.memory_space<vmem>>, vector<1x2x32xf32>
    %354 = vector.shape_cast %353 : vector<1x2x32xf32> to vector<2x32xf32>
    %355 = vector.shape_cast %351 : vector<2x32xf32> to vector<1x2x32xf32>
    tpu.vector_store %arg7[%352, %c0_77, %c0_78], %355 {strides = array<i32>} : memref<8x2x32xf32, #tpu.memory_space<vmem>>, vector<1x2x32xf32>,
    %c7_i32 = arith.constant 7 : i32
    %356 = arith.index_cast %c7_i32 : i32 to index
    %c0_79 = arith.constant 0 : index
    %c0_80 = arith.constant 0 : index
    %357 = vector.load %arg2[%356, %c0_79, %c0_80] : memref<8x2x128xbf16, #tpu.memory_space<vmem>>, vector<1x2x128xbf16>
    %358 = vector.shape_cast %357 : vector<1x2x128xbf16> to vector<2x128xbf16>
    %359 = arith.extf %358 : vector<2x128xbf16> to vector<2x128xf32>
    %360 = arith.truncf %329 : vector<2x32xf32> to vector<2x32xbf16>
    %cst_81 = arith.constant dense<0.000000e+00> : vector<2x128xf32>
    %361 = tpu.matmul %360, %3, %cst_81 {dimension_numbers = #tpu.dot_dimension_numbers<[1], [0], [0], [1], [0, 0, 1, 1], [], []>} : vector<2x32xbf16>, vector<32x128xbf16>, vector<2x128xf32> -> vector<2x128xf32>
    %362 = arith.addf %359, %361 : vector<2x128xf32>
    %363 = vector.extract_strided_slice %362 {offsets = [0, 0], sizes = [2, 96], strides = [1, 1]} : vector<2x128xf32> to vector<2x96xf32>
    %364 = arith.negf %363 : vector<2x96xf32>
    %365 = math.exp %364 : vector<2x96xf32>
    %cst_82 = arith.constant 1.000000e+00 : f32
    %366 = vector.broadcast %cst_82 : f32 to vector<2x96xf32>
    %367 = arith.addf %366, %365 : vector<2x96xf32>
    %368 = arith.divf %366, %367 : vector<2x96xf32>
    %369 = vector.extract_strided_slice %362 {offsets = [0, 96], sizes = [2, 32], strides = [1, 1]} : vector<2x128xf32> to vector<2x32xf32>
    %370 = math.tanh %369 : vector<2x32xf32>
    %371 = vector.extract_strided_slice %368 {offsets = [0, 0], sizes = [2, 32], strides = [1, 1]} : vector<2x96xf32> to vector<2x32xf32>
    %372 = vector.extract_strided_slice %368 {offsets = [0, 32], sizes = [2, 32], strides = [1, 1]} : vector<2x96xf32> to vector<2x32xf32>
    %373 = vector.extract_strided_slice %368 {offsets = [0, 64], sizes = [2, 32], strides = [1, 1]} : vector<2x96xf32> to vector<2x32xf32>
    %374 = arith.mulf %372, %327 : vector<2x32xf32>
    %375 = arith.mulf %371, %370 : vector<2x32xf32>
    %376 = arith.addf %374, %375 : vector<2x32xf32>
    %377 = math.tanh %376 : vector<2x32xf32>
    %378 = arith.mulf %373, %377 : vector<2x32xf32>
    %379 = arith.truncf %378 : vector<2x32xf32> to vector<2x32xbf16>
    %cst_83 = arith.constant dense<0.000000e+00> : vector<2x128xf32>
    %380 = tpu.matmul %379, %4, %cst_83 {dimension_numbers = #tpu.dot_dimension_numbers<[1], [0], [0], [1], [0, 0, 1, 1], [], []>} : vector<2x32xbf16>, vector<32x128xbf16>, vector<2x128xf32> -> vector<2x128xf32>
    %381 = arith.truncf %351 : vector<2x32xf32> to vector<2x32xbf16>
    %cst_84 = arith.constant dense<0.000000e+00> : vector<2x128xf32>
    %382 = tpu.matmul %381, %5, %cst_84 {dimension_numbers = #tpu.dot_dimension_numbers<[1], [0], [0], [1], [0, 0, 1, 1], [], []>} : vector<2x32xbf16>, vector<32x128xbf16>, vector<2x128xf32> -> vector<2x128xf32>
    %383 = arith.addf %380, %382 : vector<2x128xf32>
    %384 = arith.addf %383, %8 : vector<2x128xf32>
    %385 = vector.extract_strided_slice %384 {offsets = [0, 0], sizes = [2, 96], strides = [1, 1]} : vector<2x128xf32> to vector<2x96xf32>
    %386 = arith.negf %385 : vector<2x96xf32>
    %387 = math.exp %386 : vector<2x96xf32>
    %cst_85 = arith.constant 1.000000e+00 : f32
    %388 = vector.broadcast %cst_85 : f32 to vector<2x96xf32>
    %389 = arith.addf %388, %387 : vector<2x96xf32>
    %390 = arith.divf %388, %389 : vector<2x96xf32>
    %391 = vector.extract_strided_slice %384 {offsets = [0, 96], sizes = [2, 32], strides = [1, 1]} : vector<2x128xf32> to vector<2x32xf32>
    %392 = math.tanh %391 : vector<2x32xf32>
    %393 = vector.extract_strided_slice %390 {offsets = [0, 0], sizes = [2, 32], strides = [1, 1]} : vector<2x96xf32> to vector<2x32xf32>
    %394 = vector.extract_strided_slice %390 {offsets = [0, 32], sizes = [2, 32], strides = [1, 1]} : vector<2x96xf32> to vector<2x32xf32>
    %395 = vector.extract_strided_slice %390 {offsets = [0, 64], sizes = [2, 32], strides = [1, 1]} : vector<2x96xf32> to vector<2x32xf32>
    %396 = arith.mulf %394, %349 : vector<2x32xf32>
    %397 = arith.mulf %393, %392 : vector<2x32xf32>
    %398 = arith.addf %396, %397 : vector<2x32xf32>
    %399 = math.tanh %398 : vector<2x32xf32>
    %400 = arith.mulf %395, %399 : vector<2x32xf32>
    %401 = arith.index_cast %c7_i32 : i32 to index
    %c0_86 = arith.constant 0 : index
    %c0_87 = arith.constant 0 : index
    %402 = vector.load %arg7[%401, %c0_86, %c0_87] : memref<8x2x32xf32, #tpu.memory_space<vmem>>, vector<1x2x32xf32>
    %403 = vector.shape_cast %402 : vector<1x2x32xf32> to vector<2x32xf32>
    %404 = vector.shape_cast %400 : vector<2x32xf32> to vector<1x2x32xf32>
    tpu.vector_store %arg7[%401, %c0_86, %c0_87], %404 {strides = array<i32>} : memref<8x2x32xf32, #tpu.memory_space<vmem>>, vector<1x2x32xf32>,
    %c8_i32 = arith.constant 8 : i32
    %c0_88 = arith.constant 0 : index
    %c0_89 = arith.constant 0 : index
    %405 = vector.load %arg8[%c0_88, %c0_89] : memref<2x32xf32, #tpu.memory_space<vmem>>, vector<2x32xf32>
    tpu.vector_store %arg8[%c0_88, %c0_89], %378 {strides = array<i32>} : memref<2x32xf32, #tpu.memory_space<vmem>>, vector<2x32xf32>,
    %c0_90 = arith.constant 0 : index
    %c0_91 = arith.constant 0 : index
    %406 = vector.load %arg9[%c0_90, %c0_91] : memref<2x32xf32, #tpu.memory_space<vmem>>, vector<2x32xf32>
    tpu.vector_store %arg9[%c0_90, %c0_91], %376 {strides = array<i32>} : memref<2x32xf32, #tpu.memory_space<vmem>>, vector<2x32xf32>,
    %c0_92 = arith.constant 0 : index
    %c0_93 = arith.constant 0 : index
    %407 = vector.load %arg10[%c0_92, %c0_93] : memref<2x32xf32, #tpu.memory_space<vmem>>, vector<2x32xf32>
    tpu.vector_store %arg10[%c0_92, %c0_93], %400 {strides = array<i32>} : memref<2x32xf32, #tpu.memory_space<vmem>>, vector<2x32xf32>,
    %c0_94 = arith.constant 0 : index
    %c0_95 = arith.constant 0 : index
    %408 = vector.load %arg11[%c0_94, %c0_95] : memref<2x32xf32, #tpu.memory_space<vmem>>, vector<2x32xf32>
    tpu.vector_store %arg11[%c0_94, %c0_95], %398 {strides = array<i32>} : memref<2x32xf32, #tpu.memory_space<vmem>>, vector<2x32xf32>,
    return
  }
  func.func @transform_0(%arg0: i32, %arg1: i32) -> (i32, i32, i32) {
    %c0_i32 = arith.constant 0 : i32
    %c0_i32_0 = arith.constant 0 : i32
    return %arg1, %arg0, %c0_i32 : i32, i32, i32
  }
  func.func @transform_1(%arg0: i32, %arg1: i32) -> (i32, i32) {
    %c0_i32 = arith.constant 0 : i32
    %c0_i32_0 = arith.constant 0 : i32
    %c0_i32_1 = arith.constant 0 : i32
    return %c0_i32, %c0_i32_0 : i32, i32
  }
  func.func @transform_2(%arg0: i32, %arg1: i32) -> (i32, i32) {
    %c0_i32 = arith.constant 0 : i32
    %c0_i32_0 = arith.constant 0 : i32
    %c0_i32_1 = arith.constant 0 : i32
    return %c0_i32, %c0_i32_0 : i32, i32
  }
  func.func @transform_3(%arg0: i32, %arg1: i32) -> (i32, i32) {
    %c0_i32 = arith.constant 0 : i32
    %c0_i32_0 = arith.constant 0 : i32
    %c0_i32_1 = arith.constant 0 : i32
    return %c0_i32, %c0_i32_0 : i32, i32
  }
  func.func @transform_4(%arg0: i32, %arg1: i32) -> (i32, i32) {
    %c0_i32 = arith.constant 0 : i32
    %c0_i32_0 = arith.constant 0 : i32
    %c0_i32_1 = arith.constant 0 : i32
    return %c0_i32, %c0_i32_0 : i32, i32
  }
  func.func @transform_5(%arg0: i32, %arg1: i32) -> (i32, i32, i32) {
    %c0_i32 = arith.constant 0 : i32
    %c0_i32_0 = arith.constant 0 : i32
    return %arg1, %arg0, %c0_i32 : i32, i32, i32
  }
}

</mosaic_0001>

<bundles_post_ra>
// kernel: tpu_custom_call.1
= control target key start
LH: loop header
LB: loop body
LE: loop exit
PB: predicated region body
PF: predicated region fallthrough
CT: control target
= control target key end

     0   :  { %10 = vsyncpa [#allocation7], 0  ;;  %s2832_s0 = inlined_call_operand.hbm [shape: bf16[8,2,128], index: 0, kind: input, shape index: {}]   ;;  %s2833_s1 = inlined_call_operand.hbm [shape: bf16[32,128], index: 1, kind: input, shape index: {}]   ;;  %s2834_s2 = inlined_call_operand.hbm [shape: bf16[32,128], index: 2, kind: input, shape index: {}]   ;;  %s2835_s3 = inlined_call_operand.hbm [shape: bf16[32,128], index: 3, kind: input, shape index: {}]   ;;  %s2836_s4 = inlined_call_operand.vmem [shape: f32[1,128], index: 4, kind: input, shape index: {}]   ;;  %s2837_s5 = inlined_call_operand.hbm [shape: f32[8,2,32], index: 5, kind: output, shape index: {}]  }
   0x1   :  { %11 = vsyncpa [#allocation10], 0 }
   0x2   :  { %12 = vsyncpa [#allocation13], 0 }
   0x3   :  { %13 = vsyncpa [#allocation8], 0  ;;  %s2340_s18 = smov [#allocation9]   ;;  %s2222_s22 = scalar_lea.hbm %s2833_s1, 256 }
   0x4   :  { %s31_s19 = sshll.u32 %s2340_s18, 4  ;;  %p2223_p0 = scmp.ne.s32.totalorder %s2833_s1, %s2222_s22  ;;  %s32_s19 = int_to_ptr.vmem [resolvable:$true] %s31_s19 }
   0x5   :  { %p2226_p1 = scmp.lt.u32.totalorder %s2222_s22, %s2833_s1 }
   0x7   :  { %p2228_p2 = pnand %p2226_p1, %p2223_p0 }
   0x9   :  { %2231 = shalt.err (!%p2228_p2)
}
   0xa   :  { %s2232_s27 = scalar_lea.vmem %s32_s19, 256  ;;  %p2237_p4 = scmp.lt.s32.totalorder %s32_s19, %s32_s19 }
   0xb   :  { %p2233_p3 = scmp.ne.s32.totalorder %s32_s19, %s2232_s27  ;;  %p2238_p5 = scmp.lt.s32.totalorder %s2232_s27, %s2232_s27 }
   0xd   :  { %p2239_p6 = por %p2238_p5, %p2237_p4 }
   0xf   :  { %p2240_p7 = pnand %p2239_p6, %p2233_p3 }
  0x11   :  { %2243 = shalt.err (!%p2240_p7)
}
  0x12   :  { %s2341_s28 = smov 64   ;;  %s2342_s29 = smov 4  }
  0x13   :  { %37 = dma.hbm_to_vmem [thread:$0]  %s2833_s1, 256, %s32_s19, [#allocation10], %s2341_s28, %s2341_s28, %s2342_s29  }
  0x14   :  { %s2343_s7 = smov [#allocation6]   ;;  %s2244_s11 = scalar_lea.hbm %s2832_s0, 128 }
  0x15   :  { %s19_s8 = sshll.u32 %s2343_s7, 4  ;;  %p2245_p8 = scmp.ne.s32.totalorder %s2832_s0, %s2244_s11  ;;  %s20_s8 = int_to_ptr.vmem [resolvable:$true] %s19_s8 }
  0x16   :  { %p2248_p9 = scmp.lt.u32.totalorder %s2244_s11, %s2832_s0 }
  0x18   :  { %p2250_p10 = pnand %p2248_p9, %p2245_p8 }
  0x1a   :  { %2253 = shalt.err (!%p2250_p10)
}
  0x1b   :  { %s2254_s16 = scalar_lea.vmem %s20_s8, 128  ;;  %p2259_p12 = scmp.lt.s32.totalorder %s20_s8, %s20_s8 }
  0x1c   :  { %p2255_p11 = scmp.ne.s32.totalorder %s20_s8, %s2254_s16  ;;  %p2260_p13 = scmp.lt.s32.totalorder %s2254_s16, %s2254_s16 }
  0x1e   :  { %p2261_p0 = por %p2260_p13, %p2259_p12 }
  0x20   :  { %p2262_p1 = pnand %p2261_p0, %p2255_p11 }
  0x22   :  { %2265 = shalt.err (!%p2262_p1)
}
  0x23   :  { %s2344_s1 = smov 16   ;;  %s2345_s17 = smov 1  }
  0x24   :  { %25 = dma.hbm_to_vmem [thread:$0]  %s2832_s0, 128, %s20_s8, [#allocation7], %s2344_s1, %s2344_s1, %s2345_s17  }
  0x25   :  { %s2346_s20 = smov [#allocation11]   ;;  %s2347_s22 = smov [#allocation12]  }
  0x26   :  { %s43_s21 = sshll.u32 %s2346_s20, 4  ;;  %s55_s23 = sshll.u32 %s2347_s22, 4  ;;  %s44_s21 = int_to_ptr.vmem [resolvable:$true] %s43_s21  ;;  %s2412_s23 = int_to_ptr.vmem [resolvable:$true] %s55_s23 }
  0x27   :  { %s2266_s26 = scalar_lea.hbm %s2834_s2, 256 }
  0x28   :  { %p2267_p2 = scmp.ne.s32.totalorder %s2834_s2, %s2266_s26  ;;  %p2270_p3 = scmp.lt.u32.totalorder %s2266_s26, %s2834_s2 }
  0x2a   :  { %p2272_p4 = pnand %p2270_p3, %p2267_p2 }
  0x2c   :  { %2275 = shalt.err (!%p2272_p4)
}
  0x2d   :  { %s2276_s0 = scalar_lea.vmem %s44_s21, 256  ;;  %p2281_p6 = scmp.lt.s32.totalorder %s44_s21, %s44_s21 }
  0x2e   :  { %p2277_p5 = scmp.ne.s32.totalorder %s44_s21, %s2276_s0  ;;  %p2282_p7 = scmp.lt.s32.totalorder %s2276_s0, %s2276_s0 }
  0x30   :  { %p2283_p8 = por %p2282_p7, %p2281_p6 }
  0x32   :  { %p2284_p9 = pnand %p2283_p8, %p2277_p5 }
  0x34   :  { %2287 = shalt.err (!%p2284_p9)
}
  0x35   :  { %49 = dma.hbm_to_vmem [thread:$0]  %s2834_s2, 256, %s44_s21, [#allocation10], %s2341_s28, %s2341_s28, %s2342_s29  }
  0x36   :  { %s2288_s12 = scalar_lea.hbm %s2835_s3, 256 }
  0x37   :  { %p2289_p10 = scmp.ne.s32.totalorder %s2835_s3, %s2288_s12  ;;  %p2292_p11 = scmp.lt.u32.totalorder %s2288_s12, %s2835_s3 }
  0x39   :  { %p2294_p12 = pnand %p2292_p11, %p2289_p10 }
  0x3b   :  { %2297 = shalt.err (!%p2294_p12)
}
  0x3c   :  { %s2298_s1 = scalar_lea.vmem %s2412_s23, 256  ;;  %p2303_p0 = scmp.lt.s32.totalorder %s2412_s23, %s2412_s23 }
  0x3d   :  { %p2299_p13 = scmp.ne.s32.totalorder %s2412_s23, %s2298_s1  ;;  %p2304_p1 = scmp.lt.s32.totalorder %s2298_s1, %s2298_s1 }
  0x3f   :  { %p2305_p2 = por %p2304_p1, %p2303_p0 }
  0x41   :  { %p2306_p3 = pnand %p2305_p2, %p2299_p13 }
  0x43   :  { %2309 = shalt.err (!%p2306_p3)
}
  0x44   :  { %61 = dma.hbm_to_vmem [thread:$0]  %s2835_s3, 256, %s2412_s23, [#allocation13], %s2341_s28, %s2341_s28, %s2342_s29  }
  0x45   :  { %2332 = dma.done.wait [#allocation7], 128  }
  0x46   :  { %2333 = vsyncadd [#allocation7], 4294967168 }
  0x47   :  { %2334 = dma.done.wait [#allocation10], 512  }
  0x48   :  { %2335 = vsyncadd [#allocation10], 4294966784 }
  0x49   :  { %2336 = dma.done.wait [#allocation13], 256  }
  0x4a   :  { %2337 = vsyncadd [#allocation13], 4294967040  ;;  %vm81_vm0 = vcmask 254976   ;;  %v2348_v0 = vmov 0.0   ;;  %vm2349_vm1 = vmmov 0   ;;  %v2463_v1 = vld [vmem:[#allocation9] sm:$0xff]  }
  0x4b   :  { %1874 = vmatprep.subr.bf16.mxu0 %v2348_v0  ;;  %1878 = vmatprep.mubr.msk.bf16.mxu0 %vm2349_vm1, %v2348_v0  ;;  %82 = vst.msk [vmem:[#allocation2] sm:$0x3] %vm81_vm0, %v2348_v0  ;;  %83 = vst.msk [vmem:[#allocation3] sm:$0x3] %vm81_vm0, %v2348_v0  ;;  %v2466_v2 = vld [vmem:[#allocation9 + $0x8] sm:$0xff]   ;;  %vm124_vm2 = vcmask 261120  }
  0x4c   :  { %84 = vst.msk [vmem:[#allocation4] sm:$0x3] %vm81_vm0, %v2348_v0  ;;  %85 = vst.msk [vmem:[#allocation5] sm:$0x3] %vm81_vm0, %v2348_v0  ;;  %1882 = vmatprep.subr.bf16.mxu1 %v2348_v0  ;;  %1886 = vmatprep.mubr.msk.bf16.mxu1 %vm2349_vm1, %v2348_v0  ;;  %v109_v5 = vld [vmem:[#allocation6] sm:$0x1] }
  0x4d   :  { %1875 = vmatpush3.bf16.msra.mxu0 %v2463_v1  ;;  %v110_v6 = vunpack.c.l.bf16 %v109_v5  ;;  %s2350_s3 = smov 32   ;;  %v2480_v24 = vld [vmem:[#allocation12] sm:$0xff]   ;;  %v2482_v25 = vld [vmem:[#allocation11] sm:$0xff]   ;;  %v2485_v26 = vld [vmem:[#allocation12 + $0x8] sm:$0xff]   ;;  %s2353_s21 = smov [#allocation14]  }
  0x4e   :  { %1876 = vmatprep.subr.bf16.mxu0 %v2348_v0  ;;  %1883 = vmatpush3.bf16.msra.mxu1 %v2480_v24  ;;  %v2489_v28 = vld [vmem:[#allocation11 + $0x8] sm:$0xff]   ;;  %v2522_v41 = vld [vmem:[%s2836_s4] ss:$0 sm:$0xff]  ;;  %s1740_s22 = sshll.u32 %s2353_s21, 4  ;;  %s1741_s22 = int_to_ptr.vmem [resolvable:$true] %s1740_s22 }
  0x4f   :  { %1884 = vmatprep.subr.bf16.mxu1 %v2348_v0  ;;  %v355_v39 = vld [vmem:[#allocation6 + $0x1] sm:$0x1]  ;;  %p2315_p5 = scmp.lt.s32.totalorder %s1741_s22, %s1741_s22 }
  0x50   :  { %v356_v40 = vunpack.c.l.bf16 %v355_v39 }
  0x51   :  { %1877 = vmatpush3.bf16.msra.mxu0 %v2466_v2 }
  0x52   :  { %v105_v3 = vld [vmem:[#allocation2] sm:$0x3]  ;;  %1890 = vmatprep.subr.bf16.mxu0 %v2348_v0  ;;  %v1759_v13 = vld.sshfl [vmem:[#allocation3] sm:$0x3 pattern:$0x76325410]  ;;  %1885 = vmatpush3.bf16.msra.mxu1 %v2485_v26 }
  0x53   :  { %v111_v4 = vpack.c.bf16 %v105_v3, %v105_v3  ;;  %v107_v27 = vld [vmem:[#allocation4] sm:$0x3]  ;;  %1898 = vmatprep.subr.bf16.mxu1 %v2348_v0  ;;  %v108_v55 = vld [vmem:[#allocation5] sm:$0x3] }
  0x54   :  { %v205_v29 = vpack.c.bf16 %v107_v27, %v107_v27 }
  0x55   :  { %1879 = vmatmul.mubr.msk.bf16.vlgmr.msra.gmra.mrb[0].mxu0 %vm124_vm2, %v111_v4 }
  0x56   :  { %1894 = vmatprep.mubr.msk.bf16.mxu0 %vm2349_vm1, %v2348_v0  ;;  %1891 = vmatpush3.bf16.msra.mxu0 %v2482_v25 }
  0x57   :  { %1892 = vmatprep.subr.bf16.mxu0 %v2348_v0  ;;  %1887 = vmatmul.mubr.msk.bf16.vlgmr.msra.gmra.mrb[0].mxu1 %vm124_vm2, %v205_v29 }
  0x58   :  { %1899 = vmatpush3.bf16.msra.mxu1 %v2463_v1  ;;  %1902 = vmatprep.mubr.msk.bf16.mxu1 %vm2349_vm1, %v2348_v0 }
  0x59   :  { %1900 = vmatprep.subr.bf16.mxu1 %v2348_v0 }
  0x5a   :  { %1893 = vmatpush3.bf16.msra.mxu0 %v2489_v28 }
  0x5b   :  { %1906 = vmatprep.subr.bf16.mxu0 %v2348_v0 }
  0x5c   :  { %1901 = vmatpush3.bf16.msra.mxu1 %v2466_v2 }
  0x5d   :  { %1914 = vmatprep.subr.bf16.mxu1 %v2348_v0 }
 0x128   :  { %v162_v7 = vpop.f32.mrb[0].mxu0 }
 0x129   :  { %v168_v8 = vadd.f32 %v162_v7, %v110_v6  ;;  %v1880_v9 = vpop.f32.mrb[1].mxu0 }
 0x12a   :  { %v165_v10 = vpop.f32.mrb[2].mxu0  ;;  %v255_v34 = vpop.f32.mrb[0].mxu1 }
 0x12b   :  { %2087 = vtanh.f32 %v168_v8  ;;  %v1881_v11 = vpop.f32.mrb[3].mxu0  ;;  %v1758_v14 = vmul.f32 -1.442695, %v168_v8  ;;  %v1888_v35 = vpop.f32.mrb[1].mxu1 }
 0x12c   :  { %v258_v36 = vpop.f32.mrb[2].mxu1 }
 0x12d   :  { %2089 = vpow2.f32 %v1758_v14  ;;  %v1889_v37 = vpop.f32.mrb[3].mxu1  ;;  %v548_v36 = vld [vmem:[#allocation6 + $0x2] sm:$0x1] }
 0x12e   :  { %v549_v39 = vunpack.c.l.bf16 %v548_v36 }
 0x135   :  { %v2088_v12 = vpop.eup %2087 }
 0x136   :  { %189 = vrot.lane.b32.xlu0 %v2088_v12, %s2350_s3 }
 0x137   :  { %v2090_v15 = vpop.eup %2089 }
 0x138   :  { %v172_v16 = vadd.f32 1.0, %v2090_v15 }
 0x13a   :  { %184 = vrot.lane.b32.xlu0 %v1759_v13, %s2350_s3  ;;  %2091 = vrcp.f32 %v172_v16 }
 0x144   :  { %v2092_v17 = vpop.eup %2091 }
 0x1a8   :  { %v190_v18 = vpop.permute.xlu0 %189 }
 0x1a9   :  { %v192_v19 = vmul.f32 %v2092_v17, %v190_v18 }
 0x1ab   :  { %194 = vrot.lane.b32.xlu1 %v192_v19, %s2350_s3 }
 0x1ac   :  { %v185_v20 = vpop.permute.xlu0 %184 }
 0x1ad   :  { %v187_v21 = vmul.f32 %v2092_v17, %v185_v20 }
 0x21d   :  { %v195_v22 = vpop.permute.xlu1 %194 }
 0x21e   :  { %v2477_v23 = vadd.f32 %v195_v22, %v187_v21 }
 0x220   :  { %2093 = vtanh.f32 %v2477_v23 }
 0x22a   :  { %v2094_v30 = vpop.eup %2093 }
 0x22b   :  { %200 = vrot.lane.b32.xlu1 %v2094_v30, %s2350_s3 }
 0x29d   :  { %v201_v31 = vpop.permute.xlu1 %200 }
 0x29e   :  { %v203_v32 = vmul.f32 %v2092_v17, %v201_v31 }
 0x2a0   :  { %v204_v33 = vpack.c.bf16 %v203_v32, %v203_v32 }
 0x2a2   :  { %262 = vrot.lane.b32.xlu0 %v204_v33, %s2341_s28 }
 0x314   :  { %v263_v38 = vpop.permute.xlu0 %262 }
 0x315   :  { %1895 = vmatmul.mubr.msk.bf16.vlgmr.msra.gmra.mrb[4].mxu0 %vm124_vm2, %v263_v38  ;;  %1903 = vmatmul.mubr.msk.bf16.vlgmr.msra.gmra.mrb[4].mxu1 %vm124_vm2, %v263_v38 }
 0x316   :  { %1915 = vmatpush3.bf16.msra.mxu1 %v2482_v25  ;;  %1907 = vmatpush3.bf16.msra.mxu0 %v2480_v24 }
 0x317   :  { %1916 = vmatprep.subr.bf16.mxu1 %v2348_v0  ;;  %1908 = vmatprep.subr.bf16.mxu0 %v2348_v0 }
 0x318   :  { %1918 = vmatprep.mubr.msk.bf16.mxu1 %vm2349_vm1, %v2348_v0  ;;  %1910 = vmatprep.mubr.msk.bf16.mxu0 %vm2349_vm1, %v2348_v0 }
 0x31a   :  { %1917 = vmatpush3.bf16.msra.mxu1 %v2489_v28  ;;  %1909 = vmatpush3.bf16.msra.mxu0 %v2485_v26 }
 0x31b   :  { %1922 = vmatprep.subr.bf16.mxu0 %v2348_v0  ;;  %1930 = vmatprep.subr.bf16.mxu1 %v2348_v0 }
 0x3e8   :  { %v313_v42 = vpop.f32.mrb[4].mxu0  ;;  %v391_v43 = vpop.f32.mrb[4].mxu1 }
 0x3e9   :  { %v314_v44 = vadd.f32 %v313_v42, %v255_v34  ;;  %v397_v45 = vadd.f32 %v391_v43, %v356_v40  ;;  %v1896_v46 = vpop.f32.mrb[5].mxu0  ;;  %v1904_v47 = vpop.f32.mrb[5].mxu1 }
 0x3ea   :  { %v316_v48 = vpop.f32.mrb[6].mxu0  ;;  %v394_v49 = vpop.f32.mrb[6].mxu1 }
 0x3eb   :  { %v319_v50 = vadd.f32 %v2522_v41, %v314_v44  ;;  %2095 = vtanh.f32 %v397_v45  ;;  %v1897_v51 = vpop.f32.mrb[7].mxu0  ;;  %v1905_v52 = vpop.f32.mrb[7].mxu1  ;;  %v1768_v56 = vmul.f32 -1.442695, %v397_v45 }
 0x3ed   :  { %2097 = vtanh.f32 %v319_v50  ;;  %v1766_v57 = vmul.f32 -1.442695, %v319_v50 }
 0x3ee   :  { %2099 = vpow2.f32 %v1768_v56 }
 0x3ef   :  { %2101 = vpow2.f32 %v1766_v57 }
 0x3f5   :  { %v2096_v53 = vpop.eup %2095 }
 0x3f6   :  { %407 = vrot.lane.b32.xlu0 %v2096_v53, %s2350_s3 }
 0x3f7   :  { %v2098_v54 = vpop.eup %2097 }
 0x3f8   :  { %333 = vrot.lane.b32.xlu1 %v2098_v54, %s2350_s3  ;;  %v2100_v58 = vpop.eup %2099 }
 0x3f9   :  { %v2102_v59 = vpop.eup %2101  ;;  %v401_v60 = vadd.f32 1.0, %v2100_v58 }
 0x3fa   :  { %v323_v61 = vadd.f32 1.0, %v2102_v59 }
 0x3fb   :  { %2103 = vrcp.f32 %v401_v60 }
 0x3fc   :  { %328 = vrot.lane.b32.xlu1 %v108_v55, %s2350_s3  ;;  %2105 = vrcp.f32 %v323_v61 }
 0x405   :  { %v2104_v62 = vpop.eup %2103 }
 0x406   :  { %v2106_v4 = vpop.eup %2105  ;;  %v405_v8 = vmul.f32 %v2104_v62, %v2477_v23 }
 0x468   :  { %v408_v63 = vpop.permute.xlu0 %407 }
 0x469   :  { %v410_v3 = vmul.f32 %v2104_v62, %v408_v63 }
 0x46a   :  { %v334_v5 = vpop.permute.xlu1 %333 }
 0x46b   :  { %v336_v6 = vmul.f32 %v2106_v4, %v334_v5  ;;  %412 = vrot.lane.b32.xlu1 %v410_v3, %s2350_s3 }
 0x46d   :  { %338 = vrot.lane.b32.xlu0 %v336_v6, %s2350_s3 }
 0x46e   :  { %v329_v7 = vpop.permute.xlu1 %328 }
 0x46f   :  { %v331_v10 = vmul.f32 %v2106_v4, %v329_v7 }
 0x4dd   :  { %v413_v9 = vpop.permute.xlu1 %412 }
 0x4de   :  { %v2531_v11 = vadd.f32 %v413_v9, %v405_v8 }
 0x4df   :  { %v339_v12 = vpop.permute.xlu0 %338 }
 0x4e0   :  { %2107 = vtanh.f32 %v2531_v11  ;;  %v2534_v13 = vadd.f32 %v339_v12, %v331_v10 }
 0x4e2   :  { %2109 = vtanh.f32 %v2534_v13 }
 0x4ea   :  { %v2108_v14 = vpop.eup %2107 }
 0x4eb   :  { %418 = vrot.lane.b32.xlu1 %v2108_v14, %s2350_s3 }
 0x4ec   :  { %v2110_v15 = vpop.eup %2109 }
 0x4ed   :  { %344 = vrot.lane.b32.xlu0 %v2110_v15, %s2350_s3 }
 0x55d   :  { %v419_v16 = vpop.permute.xlu1 %418 }
 0x55e   :  { %v421_v17 = vmul.f32 %v2104_v62, %v419_v16 }
 0x55f   :  { %v345_v18 = vpop.permute.xlu0 %344 }
 0x560   :  { %v422_v19 = vpack.c.bf16 %v421_v17, %v421_v17  ;;  %v2539_v20 = vmul.f32 %v2106_v4, %v345_v18  ;;  %v741_v18 = vld [vmem:[#allocation6 + $0x3] sm:$0x1] }
 0x562   :  { %471 = vrot.lane.b32.xlu1 %v422_v19, %s2341_s28  ;;  %v423_v21 = vpack.c.bf16 %v2539_v20, %v2539_v20 }
 0x564   :  { %425 = vrot.lane.b32.xlu0 %v423_v21, %s2341_s28  ;;  %v742_v21 = vunpack.c.l.bf16 %v741_v18 }
 0x5d4   :  { %v472_v22 = vpop.permute.xlu1 %471 }
 0x5d5   :  { %1919 = vmatmul.mubr.msk.bf16.vlgmr.msra.gmra.mrb[8].mxu1 %vm124_vm2, %v472_v22 }
 0x5d6   :  { %v426_v23 = vpop.permute.xlu0 %425  ;;  %1931 = vmatpush3.bf16.msra.mxu1 %v2480_v24  ;;  %1934 = vmatprep.mubr.msk.bf16.mxu1 %vm2349_vm1, %v2348_v0 }
 0x5d7   :  { %1911 = vmatmul.mubr.msk.bf16.vlgmr.msra.gmra.mrb[8].mxu0 %vm124_vm2, %v426_v23  ;;  %1932 = vmatprep.subr.bf16.mxu1 %v2348_v0 }
 0x5d8   :  { %1923 = vmatpush3.bf16.msra.mxu0 %v2463_v1  ;;  %1926 = vmatprep.mubr.msk.bf16.mxu0 %vm2349_vm1, %v2348_v0 }
 0x5d9   :  { %1924 = vmatprep.subr.bf16.mxu0 %v2348_v0 }
 0x5da   :  { %1933 = vmatpush3.bf16.msra.mxu1 %v2485_v26 }
 0x5db   :  { %1946 = vmatprep.subr.bf16.mxu1 %v2348_v0 }
 0x5dc   :  { %1925 = vmatpush3.bf16.msra.mxu0 %v2466_v2 }
 0x5dd   :  { %1938 = vmatprep.subr.bf16.mxu0 %v2348_v0 }
 0x5df   :  { %1927 = vmatmul.mubr.msk.bf16.vlgmr.msra.gmra.mrb[12].mxu0 %vm124_vm2, %v472_v22 }
 0x5e0   :  { %1939 = vmatpush3.bf16.msra.mxu0 %v2482_v25  ;;  %1942 = vmatprep.mubr.msk.bf16.mxu0 %vm2349_vm1, %v2348_v0 }
 0x5e1   :  { %1940 = vmatprep.subr.bf16.mxu0 %v2348_v0 }
 0x5e4   :  { %1941 = vmatpush3.bf16.msra.mxu0 %v2489_v28 }
 0x5e5   :  { %1954 = vmatprep.subr.bf16.mxu0 %v2348_v0 }
 0x6a8   :  { %v510_v27 = vpop.f32.mrb[8].mxu1 }
 0x6a9   :  { %v1920_v29 = vpop.f32.mrb[9].mxu1 }
 0x6aa   :  { %v464_v30 = vpop.f32.mrb[8].mxu0  ;;  %v513_v31 = vpop.f32.mrb[10].mxu1 }
 0x6ab   :  { %v511_v32 = vadd.f32 %v510_v27, %v464_v30  ;;  %v1912_v33 = vpop.f32.mrb[9].mxu0  ;;  %v1921_v34 = vpop.f32.mrb[11].mxu1 }
 0x6ac   :  { %v467_v35 = vpop.f32.mrb[10].mxu0 }
 0x6ad   :  { %v516_v37 = vadd.f32 %v2522_v41, %v511_v32  ;;  %v1913_v38 = vpop.f32.mrb[11].mxu0 }
 0x6af   :  { %2111 = vtanh.f32 %v516_v37  ;;  %v1771_v48 = vmul.f32 -1.442695, %v516_v37 }
 0x6b2   :  { %v584_v40 = vpop.f32.mrb[12].mxu0 }
 0x6b3   :  { %v590_v42 = vadd.f32 %v584_v40, %v549_v39  ;;  %v1928_v43 = vpop.f32.mrb[13].mxu0 }
 0x6b4   :  { %v587_v44 = vpop.f32.mrb[14].mxu0 }
 0x6b5   :  { %2113 = vtanh.f32 %v590_v42  ;;  %v1929_v45 = vpop.f32.mrb[15].mxu0  ;;  %v1773_v49 = vmul.f32 -1.442695, %v590_v42 }
 0x6b6   :  { %2115 = vpow2.f32 %v1771_v48 }
 0x6b7   :  { %2117 = vpow2.f32 %v1773_v49 }
 0x6b9   :  { %v2112_v46 = vpop.eup %2111 }
 0x6ba   :  { %526 = vrot.lane.b32.xlu0 %v2112_v46, %s2350_s3 }
 0x6bf   :  { %v2114_v47 = vpop.eup %2113 }
 0x6c0   :  { %600 = vrot.lane.b32.xlu1 %v2114_v47, %s2350_s3  ;;  %v2116_v50 = vpop.eup %2115 }
 0x6c1   :  { %v520_v51 = vadd.f32 1.0, %v2116_v50  ;;  %v2118_v52 = vpop.eup %2117 }
 0x6c2   :  { %v594_v53 = vadd.f32 1.0, %v2118_v52 }
 0x6c3   :  { %2119 = vrcp.f32 %v520_v51 }
 0x6c4   :  { %2121 = vrcp.f32 %v594_v53 }
 0x6cd   :  { %v2120_v54 = vpop.eup %2119 }
 0x6ce   :  { %v2122_v57 = vpop.eup %2121  ;;  %v524_v60 = vmul.f32 %v2120_v54, %v2534_v13 }
 0x6cf   :  { %v598_v63 = vmul.f32 %v2122_v57, %v2531_v11 }
 0x72c   :  { %v527_v55 = vpop.permute.xlu0 %526 }
 0x72d   :  { %v529_v56 = vmul.f32 %v2120_v54, %v527_v55 }
 0x72f   :  { %531 = vrot.lane.b32.xlu0 %v529_v56, %s2350_s3 }
 0x732   :  { %v601_v58 = vpop.permute.xlu1 %600 }
 0x733   :  { %v603_v59 = vmul.f32 %v2122_v57, %v601_v58 }
 0x735   :  { %605 = vrot.lane.b32.xlu1 %v603_v59, %s2350_s3 }
 0x7a1   :  { %v532_v61 = vpop.permute.xlu0 %531 }
 0x7a2   :  { %v2572_v62 = vadd.f32 %v532_v61, %v524_v60 }
 0x7a4   :  { %2123 = vtanh.f32 %v2572_v62 }
 0x7a7   :  { %v606_v3 = vpop.permute.xlu1 %605 }
 0x7a8   :  { %v2576_v4 = vadd.f32 %v606_v3, %v598_v63 }
 0x7aa   :  { %2125 = vtanh.f32 %v2576_v4 }
 0x7ae   :  { %v2124_v5 = vpop.eup %2123 }
 0x7af   :  { %537 = vrot.lane.b32.xlu0 %v2124_v5, %s2350_s3 }
 0x7b4   :  { %v2126_v6 = vpop.eup %2125 }
 0x7b5   :  { %611 = vrot.lane.b32.xlu1 %v2126_v6, %s2350_s3 }
 0x821   :  { %v538_v7 = vpop.permute.xlu0 %537 }
 0x822   :  { %v2581_v8 = vmul.f32 %v2120_v54, %v538_v7 }
 0x824   :  { %v616_v9 = vpack.c.bf16 %v2581_v8, %v2581_v8 }
 0x826   :  { %618 = vrot.lane.b32.xlu0 %v616_v9, %s2341_s28 }
 0x827   :  { %v612_v10 = vpop.permute.xlu1 %611 }
 0x828   :  { %v614_v11 = vmul.f32 %v2122_v57, %v612_v10 }
 0x82a   :  { %v615_v12 = vpack.c.bf16 %v614_v11, %v614_v11 }
 0x82c   :  { %664 = vrot.lane.b32.xlu1 %v615_v12, %s2341_s28 }
 0x898   :  { %v619_v13 = vpop.permute.xlu0 %618 }
 0x899   :  { %1935 = vmatmul.mubr.msk.bf16.vlgmr.msra.gmra.mrb[12].mxu1 %vm124_vm2, %v619_v13 }
 0x89a   :  { %1947 = vmatpush3.bf16.msra.mxu1 %v2463_v1  ;;  %1950 = vmatprep.mubr.msk.bf16.mxu1 %vm2349_vm1, %v2348_v0 }
 0x89b   :  { %1948 = vmatprep.subr.bf16.mxu1 %v2348_v0 }
 0x89e   :  { %1949 = vmatpush3.bf16.msra.mxu1 %v2466_v2  ;;  %v665_v14 = vpop.permute.xlu1 %664 }
 0x89f   :  { %1943 = vmatmul.mubr.msk.bf16.vlgmr.msra.gmra.mrb[16].mxu0 %vm124_vm2, %v665_v14  ;;  %1962 = vmatprep.subr.bf16.mxu1 %v2348_v0 }
 0x8a0   :  { %1955 = vmatpush3.bf16.msra.mxu0 %v2480_v24  ;;  %1958 = vmatprep.mubr.msk.bf16.mxu0 %vm2349_vm1, %v2348_v0 }
 0x8a1   :  { %1951 = vmatmul.mubr.msk.bf16.vlgmr.msra.gmra.mrb[16].mxu1 %vm124_vm2, %v665_v14  ;;  %1956 = vmatprep.subr.bf16.mxu0 %v2348_v0  ;;  %v934_v14 = vld [vmem:[#allocation6 + $0x4] sm:$0x1] }
 0x8a2   :  { %1963 = vmatpush3.bf16.msra.mxu1 %v2482_v25  ;;  %1966 = vmatprep.mubr.msk.bf16.mxu1 %vm2349_vm1, %v2348_v0 }
 0x8a3   :  { %1964 = vmatprep.subr.bf16.mxu1 %v2348_v0 }
 0x8a4   :  { %1957 = vmatpush3.bf16.msra.mxu0 %v2485_v26 }
 0x8a5   :  { %1970 = vmatprep.subr.bf16.mxu0 %v2348_v0 }
 0x8a6   :  { %1965 = vmatpush3.bf16.msra.mxu1 %v2489_v28 }
 0x8a7   :  { %1978 = vmatprep.subr.bf16.mxu1 %v2348_v0 }
 0x96c   :  { %v657_v15 = vpop.f32.mrb[12].mxu1 }
 0x96d   :  { %v1936_v16 = vpop.f32.mrb[13].mxu1 }
 0x96e   :  { %v660_v17 = vpop.f32.mrb[14].mxu1 }
 0x96f   :  { %v1937_v19 = vpop.f32.mrb[15].mxu1 }
 0x970   :  { %v935_v19 = vunpack.c.l.bf16 %v934_v14 }
 0x972   :  { %v703_v22 = vpop.f32.mrb[16].mxu0 }
 0x973   :  { %v704_v23 = vadd.f32 %v703_v22, %v657_v15  ;;  %v1944_v27 = vpop.f32.mrb[17].mxu0 }
 0x974   :  { %v706_v29 = vpop.f32.mrb[18].mxu0  ;;  %v777_v30 = vpop.f32.mrb[16].mxu1 }
 0x975   :  { %v709_v31 = vadd.f32 %v2522_v41, %v704_v23  ;;  %v783_v32 = vadd.f32 %v777_v30, %v742_v21  ;;  %v1945_v33 = vpop.f32.mrb[19].mxu0  ;;  %v1952_v34 = vpop.f32.mrb[17].mxu1 }
 0x976   :  { %v780_v35 = vpop.f32.mrb[18].mxu1 }
 0x977   :  { %2127 = vtanh.f32 %v709_v31  ;;  %v1953_v36 = vpop.f32.mrb[19].mxu1  ;;  %v1776_v39 = vmul.f32 -1.442695, %v709_v31  ;;  %v1778_v40 = vmul.f32 -1.442695, %v783_v32 }
 0x978   :  { %2129 = vtanh.f32 %v783_v32 }
 0x979   :  { %2131 = vpow2.f32 %v1776_v39 }
 0x97a   :  { %2133 = vpow2.f32 %v1778_v40 }
 0x981   :  { %v2128_v37 = vpop.eup %2127 }
 0x982   :  { %v2130_v38 = vpop.eup %2129  ;;  %719 = vrot.lane.b32.xlu0 %v2128_v37, %s2350_s3 }
 0x983   :  { %793 = vrot.lane.b32.xlu1 %v2130_v38, %s2350_s3  ;;  %v2132_v42 = vpop.eup %2131 }
 0x984   :  { %v2134_v43 = vpop.eup %2133  ;;  %v713_v44 = vadd.f32 1.0, %v2132_v42 }
 0x985   :  { %v787_v45 = vadd.f32 1.0, %v2134_v43 }
 0x986   :  { %2135 = vrcp.f32 %v713_v44 }
 0x987   :  { %2137 = vrcp.f32 %v787_v45 }
 0x990   :  { %v2136_v46 = vpop.eup %2135 }
 0x991   :  { %v2138_v48 = vpop.eup %2137  ;;  %v717_v52 = vmul.f32 %v2136_v46, %v2572_v62 }
 0x992   :  { %v791_v53 = vmul.f32 %v2138_v48, %v2576_v4 }
 0x9f4   :  { %v720_v47 = vpop.permute.xlu0 %719 }
 0x9f5   :  { %v794_v49 = vpop.permute.xlu1 %793  ;;  %v722_v50 = vmul.f32 %v2136_v46, %v720_v47 }
 0x9f6   :  { %v796_v51 = vmul.f32 %v2138_v48, %v794_v49 }
 0x9f7   :  { %724 = vrot.lane.b32.xlu0 %v722_v50, %s2350_s3 }
 0x9f8   :  { %798 = vrot.lane.b32.xlu1 %v796_v51, %s2350_s3 }
 0xa69   :  { %v725_v54 = vpop.permute.xlu0 %724 }
 0xa6a   :  { %v799_v55 = vpop.permute.xlu1 %798  ;;  %v2615_v56 = vadd.f32 %v725_v54, %v717_v52 }
 0xa6b   :  { %v2617_v57 = vadd.f32 %v799_v55, %v791_v53 }
 0xa6c   :  { %2139 = vtanh.f32 %v2615_v56 }
 0xa6d   :  { %2141 = vtanh.f32 %v2617_v57 }
 0xa76   :  { %v2140_v58 = vpop.eup %2139 }
 0xa77   :  { %v2142_v59 = vpop.eup %2141  ;;  %730 = vrot.lane.b32.xlu0 %v2140_v58, %s2350_s3 }
 0xa78   :  { %804 = vrot.lane.b32.xlu1 %v2142_v59, %s2350_s3 }
 0xae9   :  { %v731_v60 = vpop.permute.xlu0 %730 }
 0xaea   :  { %v805_v61 = vpop.permute.xlu1 %804  ;;  %v2623_v62 = vmul.f32 %v2136_v46, %v731_v60 }
 0xaeb   :  { %v807_v63 = vmul.f32 %v2138_v48, %v805_v61 }
 0xaec   :  { %v809_v3 = vpack.c.bf16 %v2623_v62, %v2623_v62 }
 0xaed   :  { %v808_v4 = vpack.c.bf16 %v807_v63, %v807_v63 }
 0xaee   :  { %811 = vrot.lane.b32.xlu0 %v809_v3, %s2341_s28 }
 0xaef   :  { %857 = vrot.lane.b32.xlu1 %v808_v4, %s2341_s28  ;;  %v1127_v4 = vld [vmem:[#allocation6 + $0x5] sm:$0x1] }
 0xb60   :  { %v812_v5 = vpop.permute.xlu0 %811 }
 0xb61   :  { %v858_v6 = vpop.permute.xlu1 %857  ;;  %1959 = vmatmul.mubr.msk.bf16.vlgmr.msra.gmra.mrb[20].mxu0 %vm124_vm2, %v812_v5 }
 0xb62   :  { %1967 = vmatmul.mubr.msk.bf16.vlgmr.msra.gmra.mrb[20].mxu1 %vm124_vm2, %v858_v6  ;;  %1971 = vmatpush3.bf16.msra.mxu0 %v2463_v1 }
 0xb63   :  { %1972 = vmatprep.subr.bf16.mxu0 %v2348_v0  ;;  %1974 = vmatprep.mubr.msk.bf16.mxu0 %vm2349_vm1, %v2348_v0 }
 0xb64   :  { %1979 = vmatpush3.bf16.msra.mxu1 %v2480_v24  ;;  %1982 = vmatprep.mubr.msk.bf16.mxu1 %vm2349_vm1, %v2348_v0 }
 0xb65   :  { %1980 = vmatprep.subr.bf16.mxu1 %v2348_v0 }
 0xb66   :  { %1973 = vmatpush3.bf16.msra.mxu0 %v2466_v2 }
 0xb67   :  { %1986 = vmatprep.subr.bf16.mxu0 %v2348_v0 }
 0xb68   :  { %1981 = vmatpush3.bf16.msra.mxu1 %v2485_v26 }
 0xb69   :  { %1975 = vmatmul.mubr.msk.bf16.vlgmr.msra.gmra.mrb[24].mxu0 %vm124_vm2, %v858_v6  ;;  %1994 = vmatprep.subr.bf16.mxu1 %v2348_v0 }
 0xb6a   :  { %1987 = vmatpush3.bf16.msra.mxu0 %v2482_v25  ;;  %1990 = vmatprep.mubr.msk.bf16.mxu0 %vm2349_vm1, %v2348_v0 }
 0xb6b   :  { %1988 = vmatprep.subr.bf16.mxu0 %v2348_v0 }
 0xb6e   :  { %1989 = vmatpush3.bf16.msra.mxu0 %v2489_v28 }
 0xb6f   :  { %2002 = vmatprep.subr.bf16.mxu0 %v2348_v0 }
 0xc34   :  { %v850_v7 = vpop.f32.mrb[20].mxu0 }
 0xc35   :  { %v896_v9 = vpop.f32.mrb[20].mxu1  ;;  %v1960_v10 = vpop.f32.mrb[21].mxu0 }
 0xc36   :  { %v897_v11 = vadd.f32 %v896_v9, %v850_v7  ;;  %v1968_v12 = vpop.f32.mrb[21].mxu1  ;;  %v853_v13 = vpop.f32.mrb[22].mxu0  ;;  %v1128_v7 = vunpack.c.l.bf16 %v1127_v4 }
 0xc37   :  { %v899_v15 = vpop.f32.mrb[22].mxu1  ;;  %v1961_v16 = vpop.f32.mrb[23].mxu0 }
 0xc38   :  { %v902_v17 = vadd.f32 %v2522_v41, %v897_v11  ;;  %v1969_v18 = vpop.f32.mrb[23].mxu1 }
 0xc3a   :  { %2143 = vtanh.f32 %v902_v17  ;;  %v1781_v32 = vmul.f32 -1.442695, %v902_v17 }
 0xc3c   :  { %v970_v21 = vpop.f32.mrb[24].mxu0 }
 0xc3d   :  { %v976_v22 = vadd.f32 %v970_v21, %v935_v19  ;;  %v1976_v23 = vpop.f32.mrb[25].mxu0 }
 0xc3e   :  { %v973_v27 = vpop.f32.mrb[26].mxu0 }
 0xc3f   :  { %2145 = vtanh.f32 %v976_v22  ;;  %v1977_v29 = vpop.f32.mrb[27].mxu0  ;;  %v1783_v33 = vmul.f32 -1.442695, %v976_v22 }
 0xc40   :  { %2147 = vpow2.f32 %v1781_v32 }
 0xc41   :  { %2149 = vpow2.f32 %v1783_v33 }
 0xc44   :  { %v2144_v30 = vpop.eup %2143 }
 0xc45   :  { %912 = vrot.lane.b32.xlu0 %v2144_v30, %s2350_s3 }
 0xc49   :  { %v2146_v31 = vpop.eup %2145 }
 0xc4a   :  { %986 = vrot.lane.b32.xlu1 %v2146_v31, %s2350_s3  ;;  %v2148_v34 = vpop.eup %2147 }
 0xc4b   :  { %v906_v35 = vadd.f32 1.0, %v2148_v34  ;;  %v2150_v36 = vpop.eup %2149 }
 0xc4c   :  { %v980_v37 = vadd.f32 1.0, %v2150_v36 }
 0xc4d   :  { %2151 = vrcp.f32 %v906_v35 }
 0xc4e   :  { %2153 = vrcp.f32 %v980_v37 }
 0xc57   :  { %v2152_v38 = vpop.eup %2151 }
 0xc58   :  { %v2154_v42 = vpop.eup %2153  ;;  %v910_v45 = vmul.f32 %v2152_v38, %v2615_v56 }
 0xc59   :  { %v984_v48 = vmul.f32 %v2154_v42, %v2617_v57 }
 0xcb7   :  { %v913_v39 = vpop.permute.xlu0 %912 }
 0xcb8   :  { %v915_v40 = vmul.f32 %v2152_v38, %v913_v39 }
 0xcba   :  { %917 = vrot.lane.b32.xlu0 %v915_v40, %s2350_s3 }
 0xcbc   :  { %v987_v43 = vpop.permute.xlu1 %986 }
 0xcbd   :  { %v989_v44 = vmul.f32 %v2154_v42, %v987_v43 }
 0xcbf   :  { %991 = vrot.lane.b32.xlu1 %v989_v44, %s2350_s3 }
 0xd2c   :  { %v918_v46 = vpop.permute.xlu0 %917 }
 0xd2d   :  { %v2656_v47 = vadd.f32 %v918_v46, %v910_v45 }
 0xd2f   :  { %2155 = vtanh.f32 %v2656_v47 }
 0xd31   :  { %v992_v49 = vpop.permute.xlu1 %991 }
 0xd32   :  { %v2660_v50 = vadd.f32 %v992_v49, %v984_v48 }
 0xd34   :  { %2157 = vtanh.f32 %v2660_v50 }
 0xd39   :  { %v2156_v51 = vpop.eup %2155 }
 0xd3a   :  { %923 = vrot.lane.b32.xlu0 %v2156_v51, %s2350_s3 }
 0xd3e   :  { %v2158_v52 = vpop.eup %2157 }
 0xd3f   :  { %997 = vrot.lane.b32.xlu1 %v2158_v52, %s2350_s3 }
 0xdac   :  { %v924_v53 = vpop.permute.xlu0 %923 }
 0xdad   :  { %v2665_v54 = vmul.f32 %v2152_v38, %v924_v53 }
 0xdaf   :  { %v1002_v55 = vpack.c.bf16 %v2665_v54, %v2665_v54 }
 0xdb1   :  { %1004 = vrot.lane.b32.xlu0 %v1002_v55, %s2341_s28  ;;  %v998_v56 = vpop.permute.xlu1 %997 }
 0xdb2   :  { %v1000_v57 = vmul.f32 %v2154_v42, %v998_v56 }
 0xdb4   :  { %v1001_v58 = vpack.c.bf16 %v1000_v57, %v1000_v57 }
 0xdb6   :  { %1050 = vrot.lane.b32.xlu1 %v1001_v58, %s2341_s28  ;;  %v1320_v58 = vld [vmem:[#allocation6 + $0x6] sm:$0x1] }
 0xe23   :  { %v1005_v59 = vpop.permute.xlu0 %1004 }
 0xe24   :  { %1983 = vmatmul.mubr.msk.bf16.vlgmr.msra.gmra.mrb[24].mxu1 %vm124_vm2, %v1005_v59 }
 0xe25   :  { %1995 = vmatpush3.bf16.msra.mxu1 %v2463_v1  ;;  %1998 = vmatprep.mubr.msk.bf16.mxu1 %vm2349_vm1, %v2348_v0 }
 0xe26   :  { %1996 = vmatprep.subr.bf16.mxu1 %v2348_v0 }
 0xe28   :  { %v1051_v60 = vpop.permute.xlu1 %1050 }
 0xe29   :  { %1997 = vmatpush3.bf16.msra.mxu1 %v2466_v2  ;;  %1991 = vmatmul.mubr.msk.bf16.vlgmr.msra.gmra.mrb[28].mxu0 %vm124_vm2, %v1051_v60 }
 0xe2a   :  { %2010 = vmatprep.subr.bf16.mxu1 %v2348_v0  ;;  %2003 = vmatpush3.bf16.msra.mxu0 %v2480_v24 }
 0xe2b   :  { %2004 = vmatprep.subr.bf16.mxu0 %v2348_v0  ;;  %2006 = vmatprep.mubr.msk.bf16.mxu0 %vm2349_vm1, %v2348_v0 }
 0xe2c   :  { %1999 = vmatmul.mubr.msk.bf16.vlgmr.msra.gmra.mrb[28].mxu1 %vm124_vm2, %v1051_v60 }
 0xe2d   :  { %2011 = vmatpush3.bf16.msra.mxu1 %v2482_v25  ;;  %2014 = vmatprep.mubr.msk.bf16.mxu1 %vm2349_vm1, %v2348_v0 }
 0xe2e   :  { %2012 = vmatprep.subr.bf16.mxu1 %v2348_v0  ;;  %2005 = vmatpush3.bf16.msra.mxu0 %v2485_v26 }
 0xe2f   :  { %2018 = vmatprep.subr.bf16.mxu0 %v2348_v0 }
 0xe31   :  { %2013 = vmatpush3.bf16.msra.mxu1 %v2489_v28 }
 0xe32   :  { %2026 = vmatprep.subr.bf16.mxu1 %v2348_v0 }
 0xef7   :  { %v1043_v61 = vpop.f32.mrb[24].mxu1 }
 0xef8   :  { %v1984_v63 = vpop.f32.mrb[25].mxu1 }
 0xef9   :  { %v1046_v3 = vpop.f32.mrb[26].mxu1  ;;  %v1321_v63 = vunpack.c.l.bf16 %v1320_v58 }
 0xefa   :  { %v1985_v5 = vpop.f32.mrb[27].mxu1 }
 0xefc   :  { %v1089_v6 = vpop.f32.mrb[28].mxu0 }
 0xefd   :  { %v1090_v9 = vadd.f32 %v1089_v6, %v1043_v61  ;;  %v1992_v10 = vpop.f32.mrb[29].mxu0 }
 0xefe   :  { %v1092_v11 = vpop.f32.mrb[30].mxu0 }
 0xeff   :  { %v1095_v12 = vadd.f32 %v2522_v41, %v1090_v9  ;;  %v1163_v13 = vpop.f32.mrb[28].mxu1  ;;  %v1993_v14 = vpop.f32.mrb[31].mxu0 }
 0xf00   :  { %v1169_v15 = vadd.f32 %v1163_v13, %v1128_v7  ;;  %v2000_v16 = vpop.f32.mrb[29].mxu1 }
 0xf01   :  { %2159 = vtanh.f32 %v1095_v12  ;;  %v1166_v17 = vpop.f32.mrb[30].mxu1  ;;  %v1786_v22 = vmul.f32 -1.442695, %v1095_v12 }
 0xf02   :  { %2161 = vtanh.f32 %v1169_v15  ;;  %v2001_v18 = vpop.f32.mrb[31].mxu1  ;;  %v1788_v23 = vmul.f32 -1.442695, %v1169_v15 }
 0xf03   :  { %2163 = vpow2.f32 %v1786_v22 }
 0xf04   :  { %2165 = vpow2.f32 %v1788_v23 }
 0xf0b   :  { %v2160_v19 = vpop.eup %2159 }
 0xf0c   :  { %v2162_v21 = vpop.eup %2161  ;;  %1105 = vrot.lane.b32.xlu0 %v2160_v19, %s2350_s3 }
 0xf0d   :  { %1179 = vrot.lane.b32.xlu1 %v2162_v21, %s2350_s3  ;;  %v2164_v27 = vpop.eup %2163 }
 0xf0e   :  { %v2166_v29 = vpop.eup %2165  ;;  %v1099_v30 = vadd.f32 1.0, %v2164_v27 }
 0xf0f   :  { %v1173_v31 = vadd.f32 1.0, %v2166_v29 }
 0xf10   :  { %2167 = vrcp.f32 %v1099_v30 }
 0xf11   :  { %2169 = vrcp.f32 %v1173_v31 }
 0xf1a   :  { %v2168_v32 = vpop.eup %2167 }
 0xf1b   :  { %v2170_v34 = vpop.eup %2169  ;;  %v1103_v38 = vmul.f32 %v2168_v32, %v2656_v47 }
 0xf1c   :  { %v1177_v39 = vmul.f32 %v2170_v34, %v2660_v50 }
 0xf7e   :  { %v1106_v33 = vpop.permute.xlu0 %1105 }
 0xf7f   :  { %v1180_v35 = vpop.permute.xlu1 %1179  ;;  %v1108_v36 = vmul.f32 %v2168_v32, %v1106_v33 }
 0xf80   :  { %v1182_v37 = vmul.f32 %v2170_v34, %v1180_v35 }
 0xf81   :  { %1110 = vrot.lane.b32.xlu0 %v1108_v36, %s2350_s3 }
 0xf82   :  { %1184 = vrot.lane.b32.xlu1 %v1182_v37, %s2350_s3 }
 0xff3   :  { %v1111_v40 = vpop.permute.xlu0 %1110 }
 0xff4   :  { %v1185_v42 = vpop.permute.xlu1 %1184  ;;  %v2699_v43 = vadd.f32 %v1111_v40, %v1103_v38 }
 0xff5   :  { %v2701_v44 = vadd.f32 %v1185_v42, %v1177_v39 }
 0xff6   :  { %2171 = vtanh.f32 %v2699_v43 }
 0xff7   :  { %2173 = vtanh.f32 %v2701_v44 }
0x1000   :  { %v2172_v45 = vpop.eup %2171 }
0x1001   :  { %v2174_v46 = vpop.eup %2173  ;;  %1116 = vrot.lane.b32.xlu0 %v2172_v45, %s2350_s3  ;;  %v2216_v45 = vld [vmem:[#allocation9 + $0x8] sm:$0xff]  }
0x1002   :  { %1190 = vrot.lane.b32.xlu1 %v2174_v46, %s2350_s3  ;;  %v2217_v46 = vld [vmem:[#allocation12] sm:$0xff]  }
0x1073   :  { %v1117_v48 = vpop.permute.xlu0 %1116 }
0x1074   :  { %v1191_v47 = vpop.permute.xlu1 %1190  ;;  %v2707_v49 = vmul.f32 %v2168_v32, %v1117_v48  ;;  %v2218_v48 = vld [vmem:[#allocation11] sm:$0xff]  }
0x1075   :  { %v1193_v50 = vmul.f32 %v2170_v34, %v1191_v47  ;;  %v2219_v47 = vld [vmem:[#allocation12 + $0x8] sm:$0xff]  }
0x1076   :  { %v1195_v51 = vpack.c.bf16 %v2707_v49, %v2707_v49 }
0x1077   :  { %v1194_v52 = vpack.c.bf16 %v1193_v50, %v1193_v50  ;;  %v2220_v50 = vld [vmem:[#allocation11 + $0x8] sm:$0xff]  }
0x1078   :  { %1197 = vrot.lane.b32.xlu0 %v1195_v51, %s2341_s28 }
0x1079   :  { %1243 = vrot.lane.b32.xlu1 %v1194_v52, %s2341_s28 }
0x10ea   :  { %v1198_v53 = vpop.permute.xlu0 %1197 }
0x10eb   :  { %v1244_v55 = vpop.permute.xlu1 %1243  ;;  %2007 = vmatmul.mubr.msk.bf16.vlgmr.msra.gmra.mrb[32].mxu0 %vm124_vm2, %v1198_v53 }
0x10ec   :  { %2015 = vmatmul.mubr.msk.bf16.vlgmr.msra.gmra.mrb[32].mxu1 %vm124_vm2, %v1244_v55  ;;  %2019 = vmatpush3.bf16.msra.mxu0 %v2463_v1 }
0x10ed   :  { %2020 = vmatprep.subr.bf16.mxu0 %v2348_v0  ;;  %2022 = vmatprep.mubr.msk.bf16.mxu0 %vm2349_vm1, %v2348_v0 }
0x10ee   :  { %2027 = vmatpush3.bf16.msra.mxu1 %v2480_v24  ;;  %2030 = vmatprep.mubr.msk.bf16.mxu1 %vm2349_vm1, %v2348_v0 }
0x10ef   :  { %2028 = vmatprep.subr.bf16.mxu1 %v2348_v0 }
0x10f0   :  { %2021 = vmatpush3.bf16.msra.mxu0 %v2466_v2 }
0x10f1   :  { %2034 = vmatprep.subr.bf16.mxu0 %v2348_v0 }
0x10f2   :  { %2029 = vmatpush3.bf16.msra.mxu1 %v2485_v26 }
0x10f3   :  { %2023 = vmatmul.mubr.msk.bf16.vlgmr.msra.gmra.mrb[36].mxu0 %vm124_vm2, %v1244_v55  ;;  %2042 = vmatprep.subr.bf16.mxu1 %v2348_v0  ;;  %v1513_v55 = vld [vmem:[#allocation6 + $0x7] sm:$0x1] }
0x10f4   :  { %2035 = vmatpush3.bf16.msra.mxu0 %v2482_v25  ;;  %2038 = vmatprep.mubr.msk.bf16.mxu0 %vm2349_vm1, %v2348_v0 }
0x10f5   :  { %2036 = vmatprep.subr.bf16.mxu0 %v2348_v0 }
0x10f8   :  { %2037 = vmatpush3.bf16.msra.mxu0 %v2489_v28 }
0x10f9   :  { %2050 = vmatprep.subr.bf16.mxu0 %v2348_v0 }
0x11be   :  { %v1236_v1 = vpop.f32.mrb[32].mxu0 }
0x11bf   :  { %v1282_v2 = vpop.f32.mrb[32].mxu1  ;;  %v2008_v24 = vpop.f32.mrb[33].mxu0 }
0x11c0   :  { %v1283_v56 = vadd.f32 %v1282_v2, %v1236_v1  ;;  %v2016_v26 = vpop.f32.mrb[33].mxu1  ;;  %v1239_v57 = vpop.f32.mrb[34].mxu0  ;;  %v1514_v24 = vunpack.c.l.bf16 %v1513_v55 }
0x11c1   :  { %v1285_v59 = vpop.f32.mrb[34].mxu1  ;;  %v2009_v60 = vpop.f32.mrb[35].mxu0 }
0x11c2   :  { %v1288_v25 = vadd.f32 %v2522_v41, %v1283_v56  ;;  %v2017_v61 = vpop.f32.mrb[35].mxu1 }
0x11c4   :  { %2175 = vtanh.f32 %v1288_v25  ;;  %v1791_v10 = vmul.f32 -1.442695, %v1288_v25 }
0x11c6   :  { %v1356_v3 = vpop.f32.mrb[36].mxu0 }
0x11c7   :  { %v1362_v4 = vadd.f32 %v1356_v3, %v1321_v63  ;;  %v2024_v5 = vpop.f32.mrb[37].mxu0 }
0x11c8   :  { %v1359_v28 = vpop.f32.mrb[38].mxu0 }
0x11c9   :  { %2177 = vtanh.f32 %v1362_v4  ;;  %v2025_v6 = vpop.f32.mrb[39].mxu0  ;;  %v1793_v11 = vmul.f32 -1.442695, %v1362_v4 }
0x11ca   :  { %2179 = vpow2.f32 %v1791_v10 }
0x11cb   :  { %2181 = vpow2.f32 %v1793_v11 }
0x11ce   :  { %v2176_v7 = vpop.eup %2175 }
0x11cf   :  { %1298 = vrot.lane.b32.xlu0 %v2176_v7, %s2350_s3 }
0x11d3   :  { %v2178_v9 = vpop.eup %2177 }
0x11d4   :  { %1372 = vrot.lane.b32.xlu1 %v2178_v9, %s2350_s3  ;;  %v2180_v12 = vpop.eup %2179 }
0x11d5   :  { %v1292_v13 = vadd.f32 1.0, %v2180_v12  ;;  %v2182_v14 = vpop.eup %2181 }
0x11d6   :  { %v1366_v15 = vadd.f32 1.0, %v2182_v14 }
0x11d7   :  { %2183 = vrcp.f32 %v1292_v13 }
0x11d8   :  { %2185 = vrcp.f32 %v1366_v15 }
0x11e1   :  { %v2184_v16 = vpop.eup %2183 }
0x11e2   :  { %v2186_v19 = vpop.eup %2185  ;;  %v1296_v23 = vmul.f32 %v2184_v16, %v2699_v43  ;;  %v2215_v43 = vld [vmem:[#allocation9] sm:$0xff]  }
0x11e3   :  { %v1370_v30 = vmul.f32 %v2186_v19, %v2701_v44 }
0x1241   :  { %v1299_v17 = vpop.permute.xlu0 %1298 }
0x1242   :  { %v1301_v18 = vmul.f32 %v2184_v16, %v1299_v17 }
0x1244   :  { %1303 = vrot.lane.b32.xlu0 %v1301_v18, %s2350_s3 }
0x1246   :  { %v1373_v21 = vpop.permute.xlu1 %1372 }
0x1247   :  { %v1375_v22 = vmul.f32 %v2186_v19, %v1373_v21 }
0x1249   :  { %1377 = vrot.lane.b32.xlu1 %v1375_v22, %s2350_s3 }
0x12b6   :  { %v1304_v27 = vpop.permute.xlu0 %1303 }
0x12b7   :  { %v2740_v29 = vadd.f32 %v1304_v27, %v1296_v23 }
0x12b9   :  { %2187 = vtanh.f32 %v2740_v29 }
0x12bb   :  { %v1378_v31 = vpop.permute.xlu1 %1377 }
0x12bc   :  { %v2744_v32 = vadd.f32 %v1378_v31, %v1370_v30 }
0x12be   :  { %2189 = vtanh.f32 %v2744_v32 }
0x12c3   :  { %v2188_v33 = vpop.eup %2187 }
0x12c4   :  { %1309 = vrot.lane.b32.xlu0 %v2188_v33, %s2350_s3 }
0x12c8   :  { %v2190_v34 = vpop.eup %2189 }
0x12c9   :  { %1383 = vrot.lane.b32.xlu1 %v2190_v34, %s2350_s3 }
0x1336   :  { %v1310_v35 = vpop.permute.xlu0 %1309 }
0x1337   :  { %v2749_v36 = vmul.f32 %v2184_v16, %v1310_v35 }
0x1339   :  { %v1388_v37 = vpack.c.bf16 %v2749_v36, %v2749_v36 }
0x133b   :  { %1390 = vrot.lane.b32.xlu0 %v1388_v37, %s2341_s28  ;;  %v1384_v38 = vpop.permute.xlu1 %1383 }
0x133c   :  { %v1386_v39 = vmul.f32 %v2186_v19, %v1384_v38 }
0x133e   :  { %v1387_v40 = vpack.c.bf16 %v1386_v39, %v1386_v39 }
0x1340   :  { %1436 = vrot.lane.b32.xlu1 %v1387_v40, %s2341_s28 }
0x13ad   :  { %v1391_v42 = vpop.permute.xlu0 %1390 }
0x13ae   :  { %2031 = vmatmul.mubr.msk.bf16.vlgmr.msra.gmra.mrb[36].mxu1 %vm124_vm2, %v1391_v42 }
0x13af   :  { %2043 = vmatpush3.bf16.msra.mxu1 %v2215_v43  ;;  %2046 = vmatprep.mubr.msk.bf16.mxu1 %vm2349_vm1, %v2348_v0 }
0x13b0   :  { %2044 = vmatprep.subr.bf16.mxu1 %v2348_v0 }
0x13b2   :  { %v1437_v44 = vpop.permute.xlu1 %1436 }
0x13b3   :  { %2045 = vmatpush3.bf16.msra.mxu1 %v2216_v45  ;;  %2039 = vmatmul.mubr.msk.bf16.vlgmr.msra.gmra.mrb[40].mxu0 %vm124_vm2, %v1437_v44 }
0x13b4   :  { %2058 = vmatprep.subr.bf16.mxu1 %v2348_v0  ;;  %2051 = vmatpush3.bf16.msra.mxu0 %v2217_v46 }
0x13b5   :  { %2052 = vmatprep.subr.bf16.mxu0 %v2348_v0  ;;  %2054 = vmatprep.mubr.msk.bf16.mxu0 %vm2349_vm1, %v2348_v0 }
0x13b6   :  { %2047 = vmatmul.mubr.msk.bf16.vlgmr.msra.gmra.mrb[40].mxu1 %vm124_vm2, %v1437_v44 }
0x13b7   :  { %2059 = vmatpush3.bf16.msra.mxu1 %v2218_v48  ;;  %2062 = vmatprep.mubr.msk.bf16.mxu1 %vm2349_vm1, %v2348_v0  ;;  %v2221_v48 = vld [vmem:[%s2836_s4] ss:$0 sm:$0xff]  ;;  %s2352_s4 = smov 96  }
0x13b8   :  { %2060 = vmatprep.subr.bf16.mxu1 %v2348_v0  ;;  %2053 = vmatpush3.bf16.msra.mxu0 %v2219_v47 }
0x13bb   :  { %2061 = vmatpush3.bf16.msra.mxu1 %v2220_v50 }
0x1481   :  { %v1429_v51 = vpop.f32.mrb[36].mxu1 }
0x1482   :  { %v2032_v52 = vpop.f32.mrb[37].mxu1 }
0x1483   :  { %v1432_v53 = vpop.f32.mrb[38].mxu1 }
0x1484   :  { %v2033_v1 = vpop.f32.mrb[39].mxu1 }
0x1486   :  { %v1475_v2 = vpop.f32.mrb[40].mxu0 }
0x1487   :  { %v1476_v56 = vadd.f32 %v1475_v2, %v1429_v51  ;;  %v2040_v26 = vpop.f32.mrb[41].mxu0 }
0x1488   :  { %v1478_v57 = vpop.f32.mrb[42].mxu0 }
0x1489   :  { %v1481_v58 = vadd.f32 %v2522_v41, %v1476_v56  ;;  %v1549_v59 = vpop.f32.mrb[40].mxu1  ;;  %v2041_v60 = vpop.f32.mrb[43].mxu0  ;;  %v2351_v56 = vmov 1983009808   ;;  %v1709_v57 = vlaneseq }
0x148a   :  { %v1555_v25 = vadd.f32 %v1549_v59, %v1514_v24  ;;  %v2048_v0 = vpop.f32.mrb[41].mxu1  ;;  %v1707_v26 = vunpack.c.l.s4 %v2351_v56 }
0x148b   :  { %2191 = vtanh.f32 %v1481_v58  ;;  %v1552_v61 = vpop.f32.mrb[42].mxu1  ;;  %v1796_v5 = vmul.f32 -1.442695, %v1481_v58  ;;  %v1710_v59 = vshrl.u32 %v1709_v57, 7 }
0x148c   :  { %2193 = vtanh.f32 %v1555_v25  ;;  %v2049_v63 = vpop.f32.mrb[43].mxu1  ;;  %v1798_v28 = vmul.f32 -1.442695, %v1555_v25  ;;  %v1708_v58 = vunpack.c.0.s8 %v1707_v26 }
0x148d   :  { %2195 = vpow2.f32 %v1796_v5 }
0x148e   :  { %2197 = vpow2.f32 %v1798_v28  ;;  %v1711_v60 = vsub.s32 %v1708_v58, %v1710_v59 }
0x1495   :  { %v2192_v3 = vpop.eup %2191 }
0x1496   :  { %v2194_v4 = vpop.eup %2193  ;;  %1491 = vrot.lane.b32.xlu0 %v2192_v3, %s2350_s3 }
0x1497   :  { %1565 = vrot.lane.b32.xlu1 %v2194_v4, %s2350_s3  ;;  %v2196_v6 = vpop.eup %2195 }
0x1498   :  { %v2198_v41 = vpop.eup %2197  ;;  %v1485_v7 = vadd.f32 1.0, %v2196_v6 }
0x1499   :  { %v1559_v9 = vadd.f32 1.0, %v2198_v41 }
0x149a   :  { %2199 = vrcp.f32 %v1485_v7 }
0x149b   :  { %2201 = vrcp.f32 %v1559_v9 }
0x14a4   :  { %v2200_v10 = vpop.eup %2199 }
0x14a5   :  { %v2202_v12 = vpop.eup %2201  ;;  %v1489_v16 = vmul.f32 %v2200_v10, %v2740_v29 }
0x14a6   :  { %v1563_v17 = vmul.f32 %v2202_v12, %v2744_v32 }
0x1508   :  { %v1492_v11 = vpop.permute.xlu0 %1491 }
0x1509   :  { %v1566_v13 = vpop.permute.xlu1 %1565  ;;  %v1494_v14 = vmul.f32 %v2200_v10, %v1492_v11 }
0x150a   :  { %v1568_v15 = vmul.f32 %v2202_v12, %v1566_v13 }
0x150b   :  { %1496 = vrot.lane.b32.xlu0 %v1494_v14, %s2350_s3 }
0x150c   :  { %1570 = vrot.lane.b32.xlu1 %v1568_v15, %s2350_s3 }
0x157d   :  { %v1497_v18 = vpop.permute.xlu0 %1496 }
0x157e   :  { %v1571_v19 = vpop.permute.xlu1 %1570  ;;  %v1499_v21 = vadd.f32 %v1497_v18, %v1489_v16 }
0x157f   :  { %v2775_v22 = vadd.f32 %v1571_v19, %v1563_v17 }
0x1580   :  { %2203 = vtanh.f32 %v1499_v21 }
0x1581   :  { %2205 = vtanh.f32 %v2775_v22  ;;  %v1724_v9 = vrot.slane %v2775_v22, %v1711_v60 }
0x158a   :  { %v2204_v23 = vpop.eup %2203 }
0x158b   :  { %v2206_v27 = vpop.eup %2205  ;;  %1502 = vrot.lane.b32.xlu0 %v2204_v23, %s2350_s3 }
0x158c   :  { %1576 = vrot.lane.b32.xlu1 %v2206_v27, %s2350_s3 }
0x15fd   :  { %v1503_v30 = vpop.permute.xlu0 %1502 }
0x15fe   :  { %v1577_v31 = vpop.permute.xlu1 %1576  ;;  %v1505_v33 = vmul.f32 %v2200_v10, %v1503_v30 }
0x15ff   :  { %v1579_v29 = vmul.f32 %v2202_v12, %v1577_v31 }
0x1600   :  { %v1581_v34 = vpack.c.bf16 %v1505_v33, %v1505_v33 }
0x1601   :  { %v1580_v32 = vpack.c.bf16 %v1579_v29, %v1579_v29  ;;  %v1712_v25 = vrot.slane %v1579_v29, %v1711_v60 }
0x1602   :  { %1583 = vrot.lane.b32.xlu0 %v1581_v34, %s2341_s28 }
0x1603   :  { %1629 = vrot.lane.b32.xlu1 %v1580_v32, %s2341_s28 }
0x1674   :  { %v1584_v35 = vpop.permute.xlu0 %1583 }
0x1675   :  { %v1630_v37 = vpop.permute.xlu1 %1629  ;;  %2055 = vmatmul.mubr.msk.bf16.vlgmr.msra.gmra.mrb[44].mxu0 %vm124_vm2, %v1584_v35 }
0x1676   :  { %2063 = vmatmul.mubr.msk.bf16.vlgmr.msra.gmra.mrb[44].mxu1 %vm124_vm2, %v1630_v37 }
0x1748   :  { %v1622_v38 = vpop.f32.mrb[44].mxu0 }
0x1749   :  { %v1668_v39 = vpop.f32.mrb[44].mxu1  ;;  %v2056_v40 = vpop.f32.mrb[45].mxu0 }
0x174a   :  { %v1669_v42 = vadd.f32 %v1668_v39, %v1622_v38  ;;  %v2064_v43 = vpop.f32.mrb[45].mxu1  ;;  %v1625_v44 = vpop.f32.mrb[46].mxu0 }
0x174b   :  { %v1671_v45 = vpop.f32.mrb[46].mxu1  ;;  %v2057_v46 = vpop.f32.mrb[47].mxu0 }
0x174c   :  { %v1674_v47 = vadd.f32 %v2221_v48, %v1669_v42  ;;  %v2065_v50 = vpop.f32.mrb[47].mxu1 }
0x174e   :  { %2207 = vtanh.f32 %v1674_v47  ;;  %v1801_v52 = vmul.f32 -1.442695, %v1674_v47 }
0x1750   :  { %2209 = vpow2.f32 %v1801_v52 }
0x1758   :  { %v2208_v51 = vpop.eup %2207 }
0x1759   :  { %1684 = vrot.lane.b32.xlu0 %v2208_v51, %s2350_s3 }
0x175a   :  { %v2210_v53 = vpop.eup %2209 }
0x175b   :  { %v1678_v55 = vadd.f32 1.0, %v2210_v53 }
0x175d   :  { %2211 = vrcp.f32 %v1678_v55 }
0x1767   :  { %v2212_v1 = vpop.eup %2211 }
0x1768   :  { %v1682_v0 = vmul.f32 %v2212_v1, %v1499_v21 }
0x17cb   :  { %v1685_v2 = vpop.permute.xlu0 %1684 }
0x17cc   :  { %v1687_v24 = vmul.f32 %v2212_v1, %v1685_v2 }
0x17ce   :  { %1689 = vrot.lane.b32.xlu1 %v1687_v24, %s2350_s3 }
0x17d2   :  { %349 = vrot.lane.b32.xlu1 %v2539_v20, %s2341_s28 }
0x17d6   :  { %735 = vrot.lane.b32.xlu1 %v2623_v62, %s2341_s28 }
0x17da   :  { %1121 = vrot.lane.b32.xlu1 %v2707_v49, %s2341_s28 }
0x17de   :  { %1507 = vrot.lane.b32.xlu1 %v1505_v33, %s2341_s28 }
0x17e2   :  { %1713 = vrot.lane.b32.xlu1 %v1712_v25, %s2341_s28 }
0x1840   :  { %v1690_v61 = vpop.permute.xlu1 %1689 }
0x1841   :  { %v1692_v20 = vadd.f32 %v1690_v61, %v1682_v0 }
0x1843   :  { %2213 = vtanh.f32 %v1692_v20  ;;  %1731 = vrot.lane.b32.xlu1 %v1692_v20, %s2352_s4 }
0x1844   :  { %v350_v63 = vpop.permute.xlu1 %349 }
0x1845   :  { %353 = vst.msk [vmem:[#allocation14] sm:$0x3] %vm81_vm0, %v350_v63 }
0x1848   :  { %v736_v62 = vpop.permute.xlu1 %735 }
0x1849   :  { %739 = vst.msk [vmem:[#allocation14 + $0x4] sm:$0x3] %vm81_vm0, %v736_v62 }
0x184c   :  { %v1122_v3 = vpop.permute.xlu1 %1121 }
0x184d   :  { %v2214_v49 = vpop.eup %2213  ;;  %1125 = vst.msk [vmem:[#allocation14 + $0x8] sm:$0x3] %vm81_vm0, %v1122_v3 }
0x184e   :  { %1695 = vrot.lane.b32.xlu0 %v2214_v49, %s2350_s3 }
0x1850   :  { %v1508_v4 = vpop.permute.xlu1 %1507 }
0x1851   :  { %1511 = vst.msk [vmem:[#allocation14 + $0xc] sm:$0x3] %vm81_vm0, %v1508_v4 }
0x1852   :  { %542 = vrot.lane.b32.xlu0 %v2581_v8, %s2341_s28 }
0x1854   :  { %v1714_v5 = vpop.permute.xlu1 %1713 }
0x1855   :  { %1716 = vst.msk [vmem:[#allocation2] sm:$0x3] %vm81_vm0, %v1714_v5 }
0x1856   :  { %928 = vrot.lane.b32.xlu0 %v2665_v54, %s2341_s28 }
0x185a   :  { %1314 = vrot.lane.b32.xlu0 %v2749_v36, %s2341_s28 }
0x18b5   :  { %v1732_v28 = vpop.permute.xlu1 %1731 }
0x18b6   :  { %1734 = vst.msk [vmem:[#allocation5] sm:$0x3] %vm81_vm0, %v1732_v28 }
0x18c0   :  { %v1696_v6 = vpop.permute.xlu0 %1695 }
0x18c1   :  { %v1698_v41 = vmul.f32 %v2212_v1, %v1696_v6 }
0x18c3   :  { %1700 = vrot.lane.b32.xlu0 %v1698_v41, %s2341_s28  ;;  %s2310_s28 = scalar_lea.vmem %s1741_s22, 256 }
0x18c4   :  { %v543_v7 = vpop.permute.xlu0 %542  ;;  %p2311_p4 = scmp.ne.s32.totalorder %s1741_s22, %s2310_s28  ;;  %p2316_p6 = scmp.lt.s32.totalorder %s2310_s28, %s2310_s28 }
0x18c5   :  { %546 = vst.msk [vmem:[#allocation14 + $0x2] sm:$0x3] %vm81_vm0, %v543_v7 }
0x18c6   :  { %p2317_p7 = por %p2316_p6, %p2315_p5 }
0x18c7   :  { %1725 = vrot.lane.b32.xlu0 %v1724_v9, %s2352_s4 }
0x18c8   :  { %v929_v8 = vpop.permute.xlu0 %928  ;;  %p2318_p8 = pnand %p2317_p7, %p2311_p4 }
0x18c9   :  { %932 = vst.msk [vmem:[#allocation14 + $0x6] sm:$0x3] %vm81_vm0, %v929_v8 }
0x18cc   :  { %v1315_v54 = vpop.permute.xlu0 %1314 }
0x18cd   :  { %1318 = vst.msk [vmem:[#allocation14 + $0xa] sm:$0x3] %vm81_vm0, %v1315_v54 }
0x1935   :  { %v1701_v36 = vpop.permute.xlu0 %1700 }
0x1936   :  { %1704 = vst.msk [vmem:[#allocation14 + $0xe] sm:$0x3] %vm81_vm0, %v1701_v36  ;;  %1729 = vst.msk [vmem:[#allocation4] sm:$0x3] %vm81_vm0, %v1701_v36 }
0x1937   :  { %2321 = shalt.err (!%p2318_p8)
}
0x1938   :  { %s2322_s25 = scalar_lea.hbm %s2837_s5, 256 }
0x1939   :  { %p2323_p9 = scmp.ne.s32.totalorder %s2837_s5, %s2322_s25  ;;  %p2326_p10 = scmp.lt.u32.totalorder %s2322_s25, %s2837_s5 }
0x193b   :  { %p2328_p11 = pnand %p2326_p10, %p2323_p9 }
0x193d   :  { %2331 = shalt.err (!%p2328_p11)
}
0x193e   :  { %s2354_s7 = smov 2   ;;  %v1726_v10 = vpop.permute.xlu0 %1725 }
0x193f   :  { %1746 = dma.vmem_to_hbm [thread:$0]  %s1741_s22, 256, %s2837_s5, [#allocation8], %s2350_s3, %s2350_s3, %s2354_s7   ;;  %1728 = vst.msk [vmem:[#allocation3] sm:$0x3] %vm81_vm0, %v1726_v10 }
0x1940   :  { %2338 = dma.done.wait [#allocation8], 256  }
0x1941   :  { %2339 = vsyncadd [#allocation8], 4294967040 }
0x1942   :  { %1750 = vsyncpa [#allocation7], 1 }
0x1943   :  { %1751 = vsyncpa [#allocation10], 1 }
0x1944   :  { %1752 = vsyncpa [#allocation13], 1 }
0x1945   :  { %1753 = vsyncpa [#allocation8], 1 }

</bundles_post_ra>
